<compile_context>
chip_gen: v5e
topology: v5e:2x2
jax: 0.10.0
libtpu: 0.0.40
codegen_flags: <defaults>
</compile_context>

<pallas_src>
import functools

import jax
import jax.numpy as jnp
import numpy as np
from jax import lax
from jax.experimental import pallas as pl
from jax.experimental.pallas import tpu as pltpu


# --------------------------------------------------------------------------
# Host-side helpers
# --------------------------------------------------------------------------

def _vmem_capacity_bytes():
    """Per-core VMEM capacity; conservative 64 MiB (v7x) fallback."""
    try:
        info = pltpu.get_tpu_info()
        cap = getattr(info, "vmem_capacity_bytes", None)
        if cap:
            return int(cap)
    except Exception:
        pass
    return 64 * 2 ** 20


def _choose_row_split(spatial, num_blades, cg):
    """Pick S_lane | spatial so the (R, Lrow) block has minimal (8,128) padding.

    Rows  R    = cg * (spatial // S_lane)   (channel-in-group x leading spatial)
    Lanes Lrow = S_lane * num_blades        (trailing spatial x blade, blade fastest)
    Strongly prefers Lrow % 128 == 0 (unmasked, lane-dense stores).
    """
    best_key, best = None, 1
    for d in range(1, spatial + 1):
        if spatial % d:
            continue
        row_len = d * num_blades
        rows = cg * (spatial // d)
        padded = (-(-rows // 8) * 8) * (-(-row_len // 128) * 128)
        key = (row_len % 128 != 0,   # lane-dense first (biggest measured lever)
               padded,               # then minimal VMEM padding
               rows % 8 != 0,        # then full sublanes
               -row_len)             # then wider rows
        if best_key is None or key < best_key:
            best_key, best = key, d
    return best


def _choose_tile_rows(rows, lrow, target_bytes):
    """Largest divisor tr of `rows` with tr % 8 == 0 (or tr == rows) whose
    (tr, lrow) f32 tile fits `target_bytes`."""
    cands = [d for d in range(1, rows + 1)
             if rows % d == 0 and (d % 8 == 0 or d == rows)]
    max_rows = max(1, target_bytes // max(1, lrow * 4))
    fitting = [d for d in cands if d <= max_rows]
    if fitting:
        return max(fitting)
    # TODO(synk): no (8,128)-legal divisor fits the budget (e.g. prime row
    # counts); fall back to the smallest legal tile and accept the VMEM cost.
    return min(cands)


# --------------------------------------------------------------------------
# In-kernel helpers
# --------------------------------------------------------------------------

def _blade_iota(lrow, num_blades):
    """(1, Lrow) int32 lane -> blade index map (blade is lane-fastest)."""
    return lax.broadcasted_iota(jnp.int32, (1, lrow), 1) % num_blades


def _stat_scalar(stat, k):
    """Read the scalar stored at [0, k] of an (8, 128) stats block."""
    row8 = lax.broadcasted_iota(jnp.int32, stat.shape, 0)
    lane = lax.broadcasted_iota(jnp.int32, stat.shape, 1)
    return jnp.sum(jnp.where((row8 == 0) & (lane == k), stat, 0.0))


def _scalar_to_stat(val, k):
    """(8, 128) f32 block with `val` at [0, k], zeros elsewhere."""
    row8 = lax.broadcasted_iota(jnp.int32, (8, 128), 0)
    lane = lax.broadcasted_iota(jnp.int32, (8, 128), 1)
    return jnp.where((row8 == 0) & (lane == k), val, 0.0)


def _mean_map_from_stats(msum, lrow, num_blades, inv_n):
    """(1, Lrow) lane map of per-blade means, from an (8,128) blade-sum block."""
    bi = _blade_iota(lrow, num_blades)
    mean_map = jnp.where(bi == 0, _stat_scalar(msum, 0) * inv_n, 0.0)
    for k in range(1, num_blades):
        mean_map = jnp.where(bi == k, _stat_scalar(msum, k) * inv_n, mean_map)
    return mean_map


def _elem_norm_rows(xc, num_blades):
    """sqrt of per-element blade sum-of-squares, valid at anchor lanes.

    Lane layout is (trailing_spatial, blade) with blade fastest, so an
    element's blades are `num_blades` consecutive lanes; XLU lane rolls gather
    them onto the centre (anchor) lane.  Rolls never cross an element boundary
    at anchor lanes.  Returns (norm_rows, anchor).
    """
    lrow = xc.shape[1]
    sq = xc * xc
    anchor = (num_blades - 1) // 2
    t = sq
    for k in range(num_blades):
        off = k - anchor
        if off == 0:
            continue
        t = t + pltpu.roll(sq, (-off) % lrow, axis=1)
    return jnp.sqrt(t), anchor


def _apply_math(x, mean_map, inv_scale, w_col, b_rows, s_lane, out_dtype):
    """Fused affine: (x - mean) * (w * inv_scale) + lane-tiled bias."""
    a_col = w_col.astype(jnp.float32) * inv_scale                  # (rows, 1)
    b_tile = jnp.tile(b_rows.astype(jnp.float32), (1, s_lane))     # (rows, Lrow)
    return ((x - mean_map) * a_col + b_tile).astype(out_dtype)


# --------------------------------------------------------------------------
# Kernels
# --------------------------------------------------------------------------

def _g3_slab_kernel(x_ref, w_ref, b_ref, o_ref, *, num_blades, s_lane,
                    group_elems, scale_norm):
    """Single-slab fast path: one whole (n, g) group per grid step."""
    x = x_ref[...].astype(jnp.float32)                  # (R, Lrow)
    lrow = x.shape[1]
    bi = _blade_iota(lrow, num_blades)
    inv_n = 1.0 / group_elems

    # Row-first reduction: one sublane reduce, then tiny (1, Lrow) lane sums.
    col_sum = jnp.sum(x, axis=0, keepdims=True)         # (1, Lrow)
    blade_mean = [jnp.sum(jnp.where(bi == k, col_sum, 0.0)) * inv_n
                  for k in range(num_blades)]

    mean_map = jnp.where(bi == 0, blade_mean[0], 0.0)
    for k in range(1, num_blades):
        mean_map = jnp.where(bi == k, blade_mean[k], mean_map)
    xc = x - mean_map

    if scale_norm:
        norm_rows, anchor = _elem_norm_rows(xc, num_blades)
        # Row-first again: sublane reduce then one masked lane sum.
        row_norm = jnp.sum(norm_rows, axis=0, keepdims=True)
        norm_sum = jnp.sum(jnp.where(bi == anchor, row_norm, 0.0))
        # NOTE: no epsilon, matching the PyTorch reference exactly (an
        # all-constant group yields inf/NaN there too).
        inv_scale = group_elems / norm_sum
    else:
        inv_scale = 1.0

    o_ref[...] = _apply_math(xc + mean_map, mean_map, inv_scale, w_ref[...],
                             b_ref[...], s_lane, o_ref.dtype) if False else (
        (xc * (w_ref[...].astype(jnp.float32) * inv_scale)
         + jnp.tile(b_ref[...].astype(jnp.float32), (1, s_lane))
         ).astype(o_ref.dtype))


def _g3_mean_stats_kernel(x_ref, sum_ref, *, num_blades):
    """Two-pass stats sweep #1: accumulate per-(n, g) blade sums."""
    rt = pl.program_id(2)
    x = x_ref[...].astype(jnp.float32)                  # (tr, Lrow)
    lrow = x.shape[1]
    bi = _blade_iota(lrow, num_blades)
    col_sum = jnp.sum(x, axis=0, keepdims=True)
    vec = _scalar_to_stat(jnp.sum(jnp.where(bi == 0, col_sum, 0.0)), 0)
    for k in range(1, num_blades):
        vec = vec + _scalar_to_stat(jnp.sum(jnp.where(bi == k, col_sum, 0.0)), k)

    @pl.when(rt == 0)
    def _():
        sum_ref[...] = jnp.zeros_like(sum_ref)

    sum_ref[...] += vec


def _g3_norm_stats_kernel(x_ref, msum_ref, nsum_ref, *, num_blades,
                          group_elems):
    """Two-pass stats sweep #2: accumulate the per-(n, g) sum of element norms."""
    rt = pl.program_id(2)
    x = x_ref[...].astype(jnp.float32)
    lrow = x.shape[1]
    bi = _blade_iota(lrow, num_blades)
    mean_map = _mean_map_from_stats(msum_ref[...], lrow, num_blades,
                                    1.0 / group_elems)
    norm_rows, anchor = _elem_norm_rows(x - mean_map, num_blades)
    row_norm = jnp.sum(norm_rows, axis=0, keepdims=True)
    partial = jnp.sum(jnp.where(bi == anchor, row_norm, 0.0))

    @pl.when(rt == 0)
    def _():
        nsum_ref[...] = jnp.zeros_like(nsum_ref)

    nsum_ref[...] += _scalar_to_stat(partial, 0)


def _g3_apply_plain_kernel(x_ref, msum_ref, w_ref, b_ref, o_ref, *,
                           num_blades, group_elems, s_lane):
    x = x_ref[...].astype(jnp.float32)
    mean_map = _mean_map_from_stats(msum_ref[...], x.shape[1], num_blades,
                                    1.0 / group_elems)
    o_ref[...] = _apply_math(x, mean_map, 1.0, w_ref[...], b_ref[...],
                             s_lane, o_ref.dtype)


def _g3_apply_scaled_kernel(x_ref, msum_ref, nsum_ref, w_ref, b_ref, o_ref, *,
                            num_blades, group_elems, s_lane):
    x = x_ref[...].astype(jnp.float32)
    mean_map = _mean_map_from_stats(msum_ref[...], x.shape[1], num_blades,
                                    1.0 / group_elems)
    norm_sum = _stat_scalar(nsum_ref[...], 0)
    inv_scale = group_elems / norm_sum      # no epsilon: matches reference
    o_ref[...] = _apply_math(x, mean_map, inv_scale, w_ref[...], b_ref[...],
                             s_lane, o_ref.dtype)


# --------------------------------------------------------------------------
# Wrapper
# --------------------------------------------------------------------------

def clifford_g3_group_norm(x, weight, bias, num_groups, scale_norm=False, *,
                           force_two_pass=False, tile_rows=None):
    """x: (N, C, *D, I); weight: (C,); bias: (C, I)."""
    N, C = x.shape[0], x.shape[1]
    blades = x.shape[-1]
    spatial_dims = x.shape[2:-1]
    S = 1
    for d in spatial_dims:
        S *= d
    G = num_groups
    assert C % G == 0
    Cg = C // G

    s_lane = _choose_row_split(S, blades, Cg)
    s_hi = S // s_lane
    R = Cg * s_hi
    Lrow = s_lane * blades
    group_elems = Cg * S

    # Pure (free) reshapes only -- no HBM transposes.  Within a group block,
    # row r = (channel_in_group = r // s_hi, leading_spatial = r % s_hi); a
    # lane holds (trailing_spatial, blade) with blade fastest (HBM order).
    xr = x.reshape(N, G, R, Lrow)
    w_rows = jnp.repeat(weight, s_hi).reshape(G, R, 1)
    b_rows = jnp.repeat(bias, s_hi, axis=0).reshape(G, R, blades)

    cap = _vmem_capacity_bytes()
    padded_elems = (-(-R // 8) * 8) * (-(-Lrow // 128) * 128)
    itemsize = x.dtype.itemsize
    # ~6 f32 block temps + double-buffered in/out blocks at the I/O dtype.
    slab_est = padded_elems * (6 * 4 + 4 * itemsize)
    use_single = (not force_two_pass) and slab_est <= int(0.45 * cap)

    if use_single:
        kernel = functools.partial(_g3_slab_kernel, num_blades=blades,
                                   s_lane=s_lane, group_elems=group_elems,
                                   scale_norm=scale_norm)
        vmem_limit = int(min(int(0.85 * cap), max(32 << 20, 2 * slab_est)))
        out = pl.pallas_call(
            kernel,
            out_shape=jax.ShapeDtypeStruct((N, G, R, Lrow), x.dtype),
            grid_spec=pltpu.PrefetchScalarGridSpec(
                num_scalar_prefetch=0,
                grid=(N, G),
                in_specs=[
                    pl.BlockSpec((None, None, R, Lrow),
                                 lambda n, g: (n, g, 0, 0)),
                    pl.BlockSpec((None, R, 1), lambda n, g: (g, 0, 0)),
                    pl.BlockSpec((None, R, blades), lambda n, g: (g, 0, 0)),
                ],
                out_specs=pl.BlockSpec((None, None, R, Lrow),
                                       lambda n, g: (n, g, 0, 0)),
            ),
            compiler_params=pltpu.CompilerParams(
                dimension_semantics=("parallel", "parallel"),
                vmem_limit_bytes=vmem_limit),
        )(xr, w_rows, b_rows)
        return out.reshape(x.shape)

    # ---- Two-pass fallback (stats sweep + apply sweep) over row tiles ----
    if tile_rows is not None:
        tr = int(tile_rows)
        assert R % tr == 0 and (tr % 8 == 0 or tr == R)
    else:
        tr = _choose_tile_rows(R, Lrow, target_bytes=min(4 << 20, cap // 32))
    RT = R // tr
    tile_f32 = (-(-tr // 8) * 8) * (-(-Lrow // 128) * 128) * 4
    vmem_limit = int(min(int(0.85 * cap), max(32 << 20, 24 * tile_f32)))
    cp_stats = pltpu.CompilerParams(
        dimension_semantics=("parallel", "parallel", "arbitrary"),
        vmem_limit_bytes=vmem_limit)
    cp_apply = pltpu.CompilerParams(
        dimension_semantics=("parallel", "parallel", "parallel"),
        vmem_limit_bytes=vmem_limit)

    x_spec = pl.BlockSpec((None, None, tr, Lrow), lambda n, g, r: (n, g, r, 0))
    stat_spec = pl.BlockSpec((None, None, 8, 128), lambda n, g, r: (n, g, 0, 0))

    mean_sums = pl.pallas_call(
        functools.partial(_g3_mean_stats_kernel, num_blades=blades),
        out_shape=jax.ShapeDtypeStruct((N, G, 8, 128), jnp.float32),
        grid_spec=pltpu.PrefetchScalarGridSpec(
            num_scalar_prefetch=0, grid=(N, G, RT),
            in_specs=[x_spec], out_specs=stat_spec),
        compiler_params=cp_stats,
    )(xr)

    if scale_norm:
        norm_sums = pl.pallas_call(
            functools.partial(_g3_norm_stats_kernel, num_blades=blades,
                              group_elems=group_elems),
            out_shape=jax.ShapeDtypeStruct((N, G, 8, 128), jnp.float32),
            grid_spec=pltpu.PrefetchScalarGridSpec(
                num_scalar_prefetch=0, grid=(N, G, RT),
                in_specs=[x_spec, stat_spec], out_specs=stat_spec),
            compiler_params=cp_stats,
        )(xr, mean_sums)

    w_spec = pl.BlockSpec((None, tr, 1), lambda n, g, r: (g, r, 0))
    b_spec = pl.BlockSpec((None, tr, blades), lambda n, g, r: (g, r, 0))
    if scale_norm:
        apply_kernel = functools.partial(
            _g3_apply_scaled_kernel, num_blades=blades,
            group_elems=group_elems, s_lane=s_lane)
        in_specs = [x_spec, stat_spec, stat_spec, w_spec, b_spec]
        operands = (xr, mean_sums, norm_sums, w_rows, b_rows)
    else:
        apply_kernel = functools.partial(
            _g3_apply_plain_kernel, num_blades=blades,
            group_elems=group_elems, s_lane=s_lane)
        in_specs = [x_spec, stat_spec, w_spec, b_spec]
        operands = (xr, mean_sums, w_rows, b_rows)

    out = pl.pallas_call(
        apply_kernel,
        out_shape=jax.ShapeDtypeStruct((N, G, R, Lrow), x.dtype),
        grid_spec=pltpu.PrefetchScalarGridSpec(
            num_scalar_prefetch=0, grid=(N, G, RT),
            in_specs=in_specs,
            out_specs=pl.BlockSpec((None, None, tr, Lrow),
                                   lambda n, g, r: (n, g, r, 0))),
        compiler_params=cp_apply,
    )(*operands)
    return out.reshape(x.shape)


# --------------------------------------------------------------------------
# Pure-JAX reference + test
# --------------------------------------------------------------------------

def _reference(x, weight, bias, num_groups, scale_norm=False):
    N, C = x.shape[0], x.shape[1]
    blades = x.shape[-1]
    G = num_groups
    xr = x.reshape(N, G, -1, blades)
    mean = xr.mean(-2, keepdims=True)
    xr = xr - mean
    if scale_norm:
        norm = jnp.sqrt(jnp.sum(xr * xr, axis=-1, keepdims=True)).mean(
            -2, keepdims=True)
        xr = xr / norm
    xr = xr.reshape(N, C, -1, blades)
    out = xr * weight[None, :, None, None] + bias[None, :, None]
    return out.reshape(x.shape)


if __name__ == "__main__":
    key = jax.random.PRNGKey(0)
    k_x, k_w, k_b, k_x2, k_w2, k_b2 = jax.random.split(key, 6)
    ok = True

    # Case 1: single-slab fast path.
    N, C, H, W, I, G = 2, 4, 16, 16, 3, 2
    x = jax.random.normal(k_x, (N, C, H, W, I), dtype=jnp.float32)
    weight = 1.0 + 0.1 * jax.random.normal(k_w, (C,), dtype=jnp.float32)
    bias = 0.1 * jax.random.normal(k_b, (C, I), dtype=jnp.float32)
    for scale_norm in (False, True):
        out = jax.block_until_ready(
            clifford_g3_group_norm(x, weight, bias, G, scale_norm=scale_norm))
        ref = _reference(x, weight, bias, G, scale_norm=scale_norm)
        ok = bool(ok and np.allclose(np.asarray(out), np.asarray(ref),
                                     atol=2e-5, rtol=2e-5))

    # Case 2: forced two-pass (stats + apply) path with multi-step row
    # accumulation -- the path large groups take on v7x's 64 MiB VMEM.
    N2, C2, H2, W2, G2 = 1, 32, 16, 16, 2
    x2 = jax.random.normal(k_x2, (N2, C2, H2, W2, I), dtype=jnp.float32)
    w2 = 1.0 + 0.1 * jax.random.normal(k_w2, (C2,), dtype=jnp.float32)
    b2 = 0.1 * jax.random.normal(k_b2, (C2, I), dtype=jnp.float32)
    for scale_norm in (False, True):
        out = jax.block_until_ready(
            clifford_g3_group_norm(x2, w2, b2, G2, scale_norm=scale_norm,
                                   force_two_pass=True, tile_rows=8))
        ref = _reference(x2, w2, b2, G2, scale_norm=scale_norm)
        ok = bool(ok and np.allclose(np.asarray(out), np.asarray(ref),
                                     atol=2e-5, rtol=2e-5))

    print("KERNEL_OK" if ok else "MISMATCH")
</pallas_src>

<mosaic_0001>
module attributes {stable_mosaic.version = 11 : i64} {
  func.func @_g3_slab_kernel(%arg0: i32, %arg1: i32, %arg2: memref<1x1x4x384xf32, #tpu.memory_space<vmem>>, %arg3: memref<1x4x1xf32, #tpu.memory_space<vmem>>, %arg4: memref<1x4x3xf32, #tpu.memory_space<vmem>>, %arg5: memref<1x1x4x384xf32, #tpu.memory_space<vmem>>) attributes {dimension_semantics = [#tpu.dimension_semantics<parallel>, #tpu.dimension_semantics<parallel>], iteration_bounds = array<i64: 2, 2>, scalar_prefetch = 0 : i64, scratch_operands = 0 : i64, tpu.core_type = #tpu.core_type<tc>, window_params = [{transform_indices = @transform_0, window_bounds = array<i64: 1, 1, 4, 384>}, {transform_indices = @transform_1, window_bounds = array<i64: 1, 4, 1>}, {transform_indices = @transform_2, window_bounds = array<i64: 1, 4, 3>}, {transform_indices = @transform_3, window_bounds = array<i64: 1, 1, 4, 384>}]} {
    %c0 = arith.constant 0 : index
    %c0_0 = arith.constant 0 : index
    %c0_1 = arith.constant 0 : index
    %c0_2 = arith.constant 0 : index
    %0 = vector.load %arg2[%c0, %c0_0, %c0_1, %c0_2] : memref<1x1x4x384xf32, #tpu.memory_space<vmem>>, vector<1x1x4x384xf32>
    %1 = vector.shape_cast %0 : vector<1x1x4x384xf32> to vector<4x384xf32>
    %2 = tpu.iota {dimensions = array<i32: 1>} : vector<1x384xi32>
    %c3_i32 = arith.constant 3 : i32
    %c0_i32 = arith.constant 0 : i32
    %3 = arith.cmpi eq, %c3_i32, %c0_i32 : i32
    %c1_i32 = arith.constant 1 : i32
    %4 = arith.select %3, %c1_i32, %c3_i32 : i32
    %5 = vector.broadcast %4 : i32 to vector<1x384xi32>
    %6 = arith.remsi %2, %5 : vector<1x384xi32>
    %c0_i32_3 = arith.constant 0 : i32
    %7 = vector.broadcast %c0_i32_3 : i32 to vector<1x384xi32>
    %8 = arith.cmpi ne, %6, %7 : vector<1x384xi32>
    %c0_i32_4 = arith.constant 0 : i32
    %9 = vector.broadcast %c0_i32_4 : i32 to vector<1x384xi32>
    %10 = arith.cmpi slt, %6, %9 : vector<1x384xi32>
    %c0_i32_5 = arith.constant 0 : i32
    %11 = arith.cmpi slt, %4, %c0_i32_5 : i32
    %12 = vector.broadcast %11 : i1 to vector<1x384xi1>
    %13 = vector.broadcast %12 : vector<1x384xi1> to vector<1x384xi1>
    %14 = arith.xori %10, %13 : vector<1x384xi1>
    %15 = arith.andi %14, %8 : vector<1x384xi1>
    %16 = vector.broadcast %4 : i32 to vector<1x384xi32>
    %17 = arith.addi %6, %16 : vector<1x384xi32>
    %18 = arith.select %15, %17, %6 : vector<1x384xi1>, vector<1x384xi32>
    %cst = arith.constant dense<0.000000e+00> : vector<384xf32>
    %19 = vector.multi_reduction <add>, %1, %cst [0] : vector<4x384xf32> to vector<384xf32>
    %20 = vector.shape_cast %19 : vector<384xf32> to vector<1x384xf32>
    %c0_i32_6 = arith.constant 0 : i32
    %21 = vector.broadcast %c0_i32_6 : i32 to vector<1x384xi32>
    %22 = arith.cmpi eq, %18, %21 : vector<1x384xi32>
    %cst_7 = arith.constant 0.000000e+00 : f32
    %23 = vector.broadcast %cst_7 : f32 to vector<1x384xf32>
    %24 = arith.select %22, %20, %23 : vector<1x384xi1>, vector<1x384xf32>
    %25 = vector.shape_cast %24 : vector<1x384xf32> to vector<1x1x384xf32>
    %cst_8 = arith.constant dense<0.000000e+00> : vector<1xf32>
    %26 = vector.multi_reduction <add>, %25, %cst_8 [1, 2] : vector<1x1x384xf32> to vector<1xf32>
    %27 = vector.shape_cast %26 : vector<1xf32> to vector<1x1x1xf32>
    %28 = vector.extract %27[0, 0, 0] : f32 from vector<1x1x1xf32>
    %cst_9 = arith.constant 0.001953125 : f32
    %29 = arith.mulf %28, %cst_9 : f32
    %c1_i32_10 = arith.constant 1 : i32
    %30 = vector.broadcast %c1_i32_10 : i32 to vector<1x384xi32>
    %31 = arith.cmpi eq, %18, %30 : vector<1x384xi32>
    %cst_11 = arith.constant 0.000000e+00 : f32
    %32 = vector.broadcast %cst_11 : f32 to vector<1x384xf32>
    %33 = arith.select %31, %20, %32 : vector<1x384xi1>, vector<1x384xf32>
    %34 = vector.shape_cast %33 : vector<1x384xf32> to vector<1x1x384xf32>
    %cst_12 = arith.constant dense<0.000000e+00> : vector<1xf32>
    %35 = vector.multi_reduction <add>, %34, %cst_12 [1, 2] : vector<1x1x384xf32> to vector<1xf32>
    %36 = vector.shape_cast %35 : vector<1xf32> to vector<1x1x1xf32>
    %37 = vector.extract %36[0, 0, 0] : f32 from vector<1x1x1xf32>
    %cst_13 = arith.constant 0.001953125 : f32
    %38 = arith.mulf %37, %cst_13 : f32
    %c2_i32 = arith.constant 2 : i32
    %39 = vector.broadcast %c2_i32 : i32 to vector<1x384xi32>
    %40 = arith.cmpi eq, %18, %39 : vector<1x384xi32>
    %cst_14 = arith.constant 0.000000e+00 : f32
    %41 = vector.broadcast %cst_14 : f32 to vector<1x384xf32>
    %42 = arith.select %40, %20, %41 : vector<1x384xi1>, vector<1x384xf32>
    %43 = vector.shape_cast %42 : vector<1x384xf32> to vector<1x1x384xf32>
    %cst_15 = arith.constant dense<0.000000e+00> : vector<1xf32>
    %44 = vector.multi_reduction <add>, %43, %cst_15 [1, 2] : vector<1x1x384xf32> to vector<1xf32>
    %45 = vector.shape_cast %44 : vector<1xf32> to vector<1x1x1xf32>
    %46 = vector.extract %45[0, 0, 0] : f32 from vector<1x1x1xf32>
    %cst_16 = arith.constant 0.001953125 : f32
    %47 = arith.mulf %46, %cst_16 : f32
    %c0_i32_17 = arith.constant 0 : i32
    %48 = vector.broadcast %c0_i32_17 : i32 to vector<1x384xi32>
    %49 = arith.cmpi eq, %18, %48 : vector<1x384xi32>
    %cst_18 = arith.constant 0.000000e+00 : f32
    %50 = vector.broadcast %29 : f32 to vector<1x384xf32>
    %51 = vector.broadcast %cst_18 : f32 to vector<1x384xf32>
    %52 = arith.select %49, %50, %51 : vector<1x384xi1>, vector<1x384xf32>
    %c1_i32_19 = arith.constant 1 : i32
    %53 = vector.broadcast %c1_i32_19 : i32 to vector<1x384xi32>
    %54 = arith.cmpi eq, %18, %53 : vector<1x384xi32>
    %55 = vector.broadcast %38 : f32 to vector<1x384xf32>
    %56 = arith.select %54, %55, %52 : vector<1x384xi1>, vector<1x384xf32>
    %c2_i32_20 = arith.constant 2 : i32
    %57 = vector.broadcast %c2_i32_20 : i32 to vector<1x384xi32>
    %58 = arith.cmpi eq, %18, %57 : vector<1x384xi32>
    %59 = vector.broadcast %47 : f32 to vector<1x384xf32>
    %60 = arith.select %58, %59, %56 : vector<1x384xi1>, vector<1x384xf32>
    %61 = vector.broadcast %60 : vector<1x384xf32> to vector<4x384xf32>
    %62 = arith.subf %1, %61 : vector<4x384xf32>
    %c0_21 = arith.constant 0 : index
    %c0_22 = arith.constant 0 : index
    %c0_23 = arith.constant 0 : index
    %63 = vector.load %arg3[%c0_21, %c0_22, %c0_23] : memref<1x4x1xf32, #tpu.memory_space<vmem>>, vector<1x4x1xf32>
    %64 = vector.shape_cast %63 : vector<1x4x1xf32> to vector<4x1xf32>
    %cst_24 = arith.constant 1.000000e+00 : f32
    %65 = vector.broadcast %cst_24 : f32 to vector<4x1xf32>
    %66 = arith.mulf %64, %65 : vector<4x1xf32>
    %67 = vector.broadcast %66 : vector<4x1xf32> to vector<4x384xf32>
    %68 = arith.mulf %62, %67 : vector<4x384xf32>
    %c0_25 = arith.constant 0 : index
    %c0_26 = arith.constant 0 : index
    %c0_27 = arith.constant 0 : index
    %69 = vector.load %arg4[%c0_25, %c0_26, %c0_27] : memref<1x4x3xf32, #tpu.memory_space<vmem>>, vector<1x4x3xf32>
    %70 = vector.shape_cast %69 : vector<1x4x3xf32> to vector<4x3xf32>
    %71 = tpu.concatenate %70, %70, %70, %70, %70, %70, %70, %70, %70, %70, %70, %70, %70, %70, %70, %70, %70, %70, %70, %70, %70, %70, %70, %70, %70, %70, %70, %70, %70, %70, %70, %70, %70, %70, %70, %70, %70, %70, %70, %70, %70, %70, %70, %70, %70, %70, %70, %70, %70, %70, %70, %70, %70, %70, %70, %70, %70, %70, %70, %70, %70, %70, %70, %70, %70, %70, %70, %70, %70, %70, %70, %70, %70, %70, %70, %70, %70, %70, %70, %70, %70, %70, %70, %70, %70, %70, %70, %70, %70, %70, %70, %70, %70, %70, %70, %70, %70, %70, %70, %70, %70, %70, %70, %70, %70, %70, %70, %70, %70, %70, %70, %70, %70, %70, %70, %70, %70, %70, %70, %70, %70, %70, %70, %70, %70, %70, %70, %70 in 1 : vector<4x3xf32>, vector<4x3xf32>, vector<4x3xf32>, vector<4x3xf32>, vector<4x3xf32>, vector<4x3xf32>, vector<4x3xf32>, vector<4x3xf32>, vector<4x3xf32>, vector<4x3xf32>, vector<4x3xf32>, vector<4x3xf32>, vector<4x3xf32>, vector<4x3xf32>, vector<4x3xf32>, vector<4x3xf32>, vector<4x3xf32>, vector<4x3xf32>, vector<4x3xf32>, vector<4x3xf32>, vector<4x3xf32>, vector<4x3xf32>, vector<4x3xf32>, vector<4x3xf32>, vector<4x3xf32>, vector<4x3xf32>, vector<4x3xf32>, vector<4x3xf32>, vector<4x3xf32>, vector<4x3xf32>, vector<4x3xf32>, vector<4x3xf32>, vector<4x3xf32>, vector<4x3xf32>, vector<4x3xf32>, vector<4x3xf32>, vector<4x3xf32>, vector<4x3xf32>, vector<4x3xf32>, vector<4x3xf32>, vector<4x3xf32>, vector<4x3xf32>, vector<4x3xf32>, vector<4x3xf32>, vector<4x3xf32>, vector<4x3xf32>, vector<4x3xf32>, vector<4x3xf32>, vector<4x3xf32>, vector<4x3xf32>, vector<4x3xf32>, vector<4x3xf32>, vector<4x3xf32>, vector<4x3xf32>, vector<4x3xf32>, vector<4x3xf32>, vector<4x3xf32>, vector<4x3xf32>, vector<4x3xf32>, vector<4x3xf32>, vector<4x3xf32>, vector<4x3xf32>, vector<4x3xf32>, vector<4x3xf32>, vector<4x3xf32>, vector<4x3xf32>, vector<4x3xf32>, vector<4x3xf32>, vector<4x3xf32>, vector<4x3xf32>, vector<4x3xf32>, vector<4x3xf32>, vector<4x3xf32>, vector<4x3xf32>, vector<4x3xf32>, vector<4x3xf32>, vector<4x3xf32>, vector<4x3xf32>, vector<4x3xf32>, vector<4x3xf32>, vector<4x3xf32>, vector<4x3xf32>, vector<4x3xf32>, vector<4x3xf32>, vector<4x3xf32>, vector<4x3xf32>, vector<4x3xf32>, vector<4x3xf32>, vector<4x3xf32>, vector<4x3xf32>, vector<4x3xf32>, vector<4x3xf32>, vector<4x3xf32>, vector<4x3xf32>, vector<4x3xf32>, vector<4x3xf32>, vector<4x3xf32>, vector<4x3xf32>, vector<4x3xf32>, vector<4x3xf32>, vector<4x3xf32>, vector<4x3xf32>, vector<4x3xf32>, vector<4x3xf32>, vector<4x3xf32>, vector<4x3xf32>, vector<4x3xf32>, vector<4x3xf32>, vector<4x3xf32>, vector<4x3xf32>, vector<4x3xf32>, vector<4x3xf32>, vector<4x3xf32>, vector<4x3xf32>, vector<4x3xf32>, vector<4x3xf32>, vector<4x3xf32>, vector<4x3xf32>, vector<4x3xf32>, vector<4x3xf32>, vector<4x3xf32>, vector<4x3xf32>, vector<4x3xf32>, vector<4x3xf32>, vector<4x3xf32>, vector<4x3xf32>, vector<4x3xf32>, vector<4x3xf32> -> vector<4x384xf32>
    %72 = arith.addf %68, %71 : vector<4x384xf32>
    %c0_28 = arith.constant 0 : index
    %c0_29 = arith.constant 0 : index
    %c0_30 = arith.constant 0 : index
    %c0_31 = arith.constant 0 : index
    %73 = vector.load %arg5[%c0_28, %c0_29, %c0_30, %c0_31] : memref<1x1x4x384xf32, #tpu.memory_space<vmem>>, vector<1x1x4x384xf32>
    %74 = vector.shape_cast %73 : vector<1x1x4x384xf32> to vector<4x384xf32>
    %75 = vector.shape_cast %72 : vector<4x384xf32> to vector<1x1x4x384xf32>
    tpu.vector_store %arg5[%c0_28, %c0_29, %c0_30, %c0_31], %75 {strides = array<i32>} : memref<1x1x4x384xf32, #tpu.memory_space<vmem>>, vector<1x1x4x384xf32>,
    return
  }
  func.func @transform_0(%arg0: i32, %arg1: i32) -> (i32, i32, i32, i32) {
    %c0_i32 = arith.constant 0 : i32
    %c0_i32_0 = arith.constant 0 : i32
    %c0_i32_1 = arith.constant 0 : i32
    return %arg0, %arg1, %c0_i32, %c0_i32_0 : i32, i32, i32, i32
  }
  func.func @transform_1(%arg0: i32, %arg1: i32) -> (i32, i32, i32) {
    %c0_i32 = arith.constant 0 : i32
    %c0_i32_0 = arith.constant 0 : i32
    %c0_i32_1 = arith.constant 0 : i32
    return %arg1, %c0_i32, %c0_i32_0 : i32, i32, i32
  }
  func.func @transform_2(%arg0: i32, %arg1: i32) -> (i32, i32, i32) {
    %c0_i32 = arith.constant 0 : i32
    %c0_i32_0 = arith.constant 0 : i32
    %c0_i32_1 = arith.constant 0 : i32
    return %arg1, %c0_i32, %c0_i32_0 : i32, i32, i32
  }
  func.func @transform_3(%arg0: i32, %arg1: i32) -> (i32, i32, i32, i32) {
    %c0_i32 = arith.constant 0 : i32
    %c0_i32_0 = arith.constant 0 : i32
    %c0_i32_1 = arith.constant 0 : i32
    return %arg0, %arg1, %c0_i32, %c0_i32_0 : i32, i32, i32, i32
  }
}

</mosaic_0001>

<bundles_post_ra>
// kernel: tpu_custom_call.1
= control target key start
LH: loop header
LB: loop body
LE: loop exit
PB: predicated region body
PF: predicated region fallthrough
CT: control target
= control target key end

     0   :  { %8 = vsyncpa [#allocation3], 0  ;;  %s2259_s0 = inlined_call_operand.hbm [shape: f32[2,2,4,384], index: 0, kind: input, shape index: {}]   ;;  %s2260_s1 = inlined_call_operand.vmem [shape: f32[2,4,1], index: 1, kind: input, shape index: {}]   ;;  %s2261_s2 = inlined_call_operand.vmem [shape: f32[2,4,3], index: 2, kind: input, shape index: {}]   ;;  %s2262_s3 = inlined_call_operand.hbm [shape: f32[2,2,4,384], index: 3, kind: output, shape index: {}]  }
   0x1   :  { %10 = vsyncpa [#allocation3 + $0x1], 0 }
   0x2   :  { %11 = vsyncpa [#allocation4], 0 }
   0x3   :  { %13 = vsyncpa [#allocation4 + $0x1], 0  ;;  %s1765_s12 = smov 0   ;;  %s1767_s13 = smov 0  }
   0x4   :  { %s1769_s14 = smov 0   ;;  %s1771_s15 = smov 0  }
   0x5   :  { %s1773_s16 = smov 0   ;;  %s1775_s17 = smov 0  }
   0x6   :  { %s1777_s18 = smov 0   ;;  %s1779_s19 = smov 0  }
   0x7 LB: > { %s1253_s20 = sadd.s32 4294967295, %s1614_s19   ;;  %s1254_s21 = sadd.s32 4294967294, %s1614_s19   ;;  %s1614_s19 = sphi %s1779_s19, %s19_s19   ;;  %s1610_s18 = sphi %s1777_s18, %s2277_s18   ;;  %s1606_s17 = sphi %s1775_s17, %s2276_s17   ;;  %s1602_s16 = sphi %s1773_s16, %s2275_s16   ;;  %s1598_s15 = sphi %s1771_s15, %s2274_s15   ;;  %s1594_s14 = sphi %s1769_s14, %s2273_s14   ;;  %s1590_s13 = sphi %s1767_s13, %s2272_s13   ;;  %s1586_s12 = sphi %s1765_s12, %s2271_s12  }
   0x8   : > { %s28_s22 = sadd.s32 1, %s1606_s17  ;;  %s31_s23 = sadd.s32 1, %s1610_s18 }
   0x9   : > { %p29_p0 = scmp.ge.s32.totalorder %s28_s22, 2  ;;  %s40_s24 = sadd.s32 1, %s1594_s14 }
   0xa   : > { %p47_p1 = scmp.ne.s32.totalorder %s1594_s14, %s1590_s13  ;;  %p48_p2 = scmp.eq.s32.totalorder %s1614_s19, 0 }
   0xb   : > { %s2279_s22 = smov (%p29_p0, %s28_s22), 0  ;;  %s2281_s23 = smov (!%p29_p0, %s31_s23), %s1610_s18 }
   0xc   : > { %s36_s25 = ssub.s32 %s1606_s17, %s2279_s22  ;;  %p1818_p3 = por %p48_p2, %p47_p1 }
   0xd   : > { %p33_p4 = scmp.ge.s32.totalorder %s2281_s23, 2  ;;  %p53_p5 = scmp.ne.s32.totalorder %s1590_s13, %s1586_s12 }
   0xe   : > { %p54_p6 = scmp.eq.s32.totalorder %s1253_s20, 0  ;;  %p131_p7 = scmp.eq.s32.totalorder %s1253_s20, 3 }
   0xf   : > { %s2283_s23 = smov (%p33_p4, %s2281_s23), 0  ;;  %p137_p10 = scmp.eq.s32.totalorder %s1254_s21, 3 }
  0x10   : > { %2265 = sst [smem:[#allocation8_spill]] %s2283_s23  ;;  %p1826_p8 = por %p54_p6, %p53_p5 }
  0x11   : > { %p1830_p9 = por %p131_p7, %p47_p1  ;;  %s35_s29 = ssub.s32 %s1610_s18, %s2283_s23 }
  0x12   : > { %s37_s30 = sor.u32 %s36_s25, %s35_s29  ;;  %p1836_p12 = por %p137_p10, %p53_p5 }
  0x13   : > { %p38_p11 = scmp.eq.s32.totalorder %s37_s30, 0  ;;  %p1288_p13 = scmp.lt.s32.totalorder %s1614_s19, 4 }
  0x14   : > { %s157_s5 = sand.u32 1, %s1594_s14   ;;  %s1265_s8 = smul.u32 3, %s1606_s17 }
  0x15   : > { %s1843_s6 = scalar_select %p38_p11, %s1594_s14, %s40_s24  }
  0x16   : > { %s1264_s7 = smul.u32 12, %s157_s5  ;;  %p1848_p0 = pnand %p1288_p13, %p1818_p3 }
  0x17   : > { %s1266_s10 = smul.u32 6, %s1610_s18  ;;  %p1258_p1 = scmp.ge.s32.totalorder %s1614_s19, 1 }
  0x18   : > { %s161_s11 = scalar_lea.vmem [#allocation2], %s1264_s7  ;;  %p191_p2 = scmp.lt.s32.totalorder %s1614_s19, 5 }
  0x19   : > { %s172_s20 = sshll.u32 %s161_s11, 4  ;;  %s166_s21 = sadd.s32 %s1266_s10, %s1265_s8  ;;  %s173_s20 = int_to_ptr.vmem [resolvable:$true] %s172_s20 }
  0x1a   : > { %s1257_s25 = sshll.u32 %s166_s21, 2  ;;  %p192_p4 = pnand %p1258_p1, %p191_p2 }
  0x1b   : > { %s168_s24 = scalar_lea.hbm %s2259_s0, %s1257_s25  ;;  %s158_s26 = scalar_lea.sflag [#allocation3], %s157_s5 }
  0x1c   : > { %s170_s23 = sshll.u32 %s168_s24, 4  ;;  %195 = sbr.rel (%p192_p4) target bundleno = 551 (0x227), region = 32  ;;  %s171_s23 = int_to_ptr.hbm [resolvable:$true] %s170_s23 }
  0x1d   : > { %1283 = dma.hbm_to_vmem [thread:$0]  (!%p1848_p0), %s171_s23, 192, %s173_s20, %s158_s26  }
  0x1e   : > { %s1861_s7 = sand.u32 (!%p192_p4), 1, %s1590_s13  }
  0x1f   : > { %s1267_s8 = smul.u32 (!%p192_p4), 12, %s1861_s7  ;;  %s198_s10 = scalar_lea.sflag (!%p192_p4), [#allocation3], %s1861_s7 }
  0x21   : > { %s201_s11 = scalar_lea.vmem [#allocation2], %s1267_s8 }
  0x22   : > { %1577 = dma.done.wait (%p1826_p8), %s198_s10, 192  }
  0x23   : > { %1579 = vsyncadd (%p1826_p8), %s198_s10, 4294967104  ;;  %p233_p3 = scmp.lt.s32.totalorder %s1598_s15, 1  ;;  %v243_v0 = vlaneseq  ;;  %v1616_v1 = vmov 0   ;;  %v1893_v10 = vld [vmem:[%s201_s11] sm:$0xff]  ;;  %v1895_v11 = vld [vmem:[%s201_s11 + $0x8] sm:$0xf] }
  0x24   : > { %1483 = vset.pattern.permute.xlu1 %v1616_v1  ;;  %1484 = vset.pattern.permute.xlu0 %v1616_v1  ;;  %351 = vst [vmem:[#allocation1] ss:$2 sm:$0xff] %v1893_v10  ;;  %s1617_s30 = smov 9   ;;  %s1618_s24 = smov 3   ;;  %vm360_vm3 = vcmask 1043456  }
  0x25   : > { %s234_s23 = scalar_select %p233_p3, %s1598_s15, 1  ;;  %v1875_v2 = vand.u32 127, %v243_v0  ;;  %353 = vst [vmem:[#allocation1 + $0x10] ss:$2 sm:$0xff] %v1895_v11 }
  0x26   : > { %s1619_s26 = smov 24   ;;  %s1620_s10 = smov 6  }
  0x27   : > { %s1259_s5 = sshll.u32 %s234_s23, 2  ;;  %v250_v3 = vand.u32 65535, %v1875_v2  ;;  %v251_v4 = vshrl.u32 %v1875_v2, 16  ;;  %v1888_v5 = vadd.s32 128, %v1875_v2  ;;  %v1891_v6 = vadd.s32 256, %v1875_v2  ;;  %s1621_s11 = smov 21  }
  0x28   : > { %s1882_s20 = scalar_lea.vmem %s2261_s2, %s1259_s5  ;;  %s236_s29 = scalar_lea.vmem %s2260_s1, %s1259_s5 }
  0x29   : > { %v253_v7 = vmul.u32 43691, %v250_v3  ;;  %v254_v8 = vmul.u32 43690, %v250_v3  ;;  %v255_v9 = vmul.u32 43691, %v251_v4  ;;  %v1898_v12 = vld [vmem:[%s1882_s20] sm:$0xf]  ;;  %v256_v14 = vmul.u32 43690, %v251_v4 }
  0x2a   : > { %485 = vrot.lane.b32.xlu0 %v1898_v12, %s1617_s30  ;;  %479 = vrot.lane.b32.xlu2 %v1898_v12, %s1618_s24  ;;  %v465_v13 = vld [vmem:[%s236_s29] sm:$0xf]  ;;  %v279_v18 = vand.u32 65535, %v1888_v5  ;;  %v280_v19 = vshrl.u32 %v1888_v5, 16  ;;  %v308_v21 = vand.u32 65535, %v1891_v6  ;;  %v309_v22 = vshrl.u32 %v1891_v6, 16 }
  0x2b   : > { %v257_v15 = vshll.u32 %v254_v8, 16  ;;  %468 = vperm.xlu1 %1483, %v465_v13   ;;  %v258_v16 = vshrl.u32 %v254_v8, 16  ;;  %v259_v17 = vshll.u32 %v255_v9, 16  ;;  %v260_v27 = vshrl.u32 %v255_v9, 16  ;;  %s1622_s23 = smov 12   ;;  %s1623_s5 = smov 15  }
  0x2c   : > { %v282_v24 = vmul.u32 43691, %v279_v18  ;;  %v283_v25 = vmul.u32 43690, %v279_v18  ;;  %v284_v26 = vmul.u32 43691, %v280_v19  ;;  %v285_v29 = vmul.u32 43690, %v280_v19  ;;  %s1624_s9 = smov 18   ;;  %s1625_s27 = smov 27  }
  0x2d   : > { %vm261_vm0 = vc.u32 %v253_v7, %v257_v15  ;;  %v263_v20 = vadd.s32 %v257_v15, %v253_v7  ;;  %v311_v33 = vmul.u32 43691, %v308_v21  ;;  %v312_v36 = vmul.u32 43690, %v308_v21  ;;  %v354_v41 = vld.sshfl [vmem:[#allocation1] sm:$0xff pattern:$0x75316420]  ;;  %s1626_s21 = smov 36  }
  0x2e   : > { %v262_v23 = vsel %vm261_vm0, 1, %v1616_v1  ;;  %v286_v31 = vshll.u32 %v283_v25, 16  ;;  %v288_v32 = vshll.u32 %v284_v26, 16  ;;  %v287_v35 = vshrl.u32 %v283_v25, 16  ;;  %s1627_s25 = smov 45   ;;  %s1628_s29 = smov 54  }
  0x2f   : > { %v264_v28 = vadd.s32 %v262_v23, %v256_v14  ;;  %vm265_vm1 = vc.u32 %v263_v20, %v259_v17  ;;  %v313_v37 = vmul.u32 43691, %v309_v22  ;;  %v289_v38 = vshrl.u32 %v284_v26, 16  ;;  %v355_v45 = vld.sshfl [vmem:[#allocation1 + $0x8] sm:$0xff pattern:$0x75316420]  ;;  %s1629_s30 = smov 63  }
  0x30   : > { %v266_v30 = vsel %vm265_vm1, 1, %v1616_v1  ;;  %vm290_vm2 = vc.u32 %v282_v24, %v286_v31  ;;  %v292_v39 = vadd.s32 %v286_v31, %v282_v24  ;;  %v314_v40 = vmul.u32 43690, %v309_v22  ;;  %v356_v52 = vld.sshfl [vmem:[#allocation1 + $0x10] sm:$0xff pattern:$0x75316420]  ;;  %s1630_s24 = smov 30  }
  0x31   : > { %v268_v34 = vadd.s32 %v266_v30, %v264_v28  ;;  %v291_v43 = vsel %vm290_vm2, 1, %v1616_v1  ;;  %v315_v44 = vshll.u32 %v312_v36, 16  ;;  %v316_v47 = vshrl.u32 %v312_v36, 16 }
  0x32   : > { %500 = vrot.lane.b32.xlu0 %v1898_v12, %s1619_s26  ;;  %482 = vrot.lane.b32.xlu2 %v1898_v12, %s1620_s10  ;;  %v293_v46 = vadd.s32 %v291_v43, %v285_v29  ;;  %vm294_vm4 = vc.u32 %v292_v39, %v288_v32  ;;  %v317_v48 = vshll.u32 %v313_v37, 16  ;;  %v361_v55 = vsel %vm360_vm3, %v354_v41, 0.0  ;;  %s1631_s26 = smov 33   ;;  %s1632_s10 = smov 72  }
  0x33   : > { %v269_v42 = vadd.s32 %v268_v34, %v258_v16  ;;  %497 = vrot.lane.b32.xlu1 %v1898_v12, %s1621_s11  ;;  %v295_v50 = vsel %vm294_vm4, 1, %v1616_v1  ;;  %vm319_vm5 = vc.u32 %v311_v33, %v315_v44  ;;  %v321_v51 = vadd.s32 %v315_v44, %v311_v33  ;;  %s1633_s11 = smov 39  }
  0x34   : > { %v297_v53 = vadd.s32 %v295_v50, %v293_v46  ;;  %v320_v54 = vsel %vm319_vm5, 1, %v1616_v1  ;;  %v368_v56 = vsel %vm360_vm3, %v355_v45, 0.0  ;;  %v362_v59 = vrot.slane %v361_v55, 4 }
  0x35   : > { %v270_v49 = vadd.s32 %v269_v42, %v260_v27  ;;  %v322_v58 = vadd.s32 %v320_v54, %v314_v40  ;;  %vm323_vm6 = vc.u32 %v321_v51, %v317_v48  ;;  %v369_v62 = vrot.slane %v368_v56, 4 }
  0x36   : > { %v298_v60 = vadd.s32 %v297_v53, %v287_v35  ;;  %v324_v61 = vsel %vm323_vm6, 1, %v1616_v1  ;;  %v375_v63 = vsel %vm360_vm3, %v356_v52, 0.0  ;;  %v318_v0 = vshrl.u32 %v313_v37, 16 }
  0x37   : > { %v271_v57 = vshrl.u32 %v270_v49, 1  ;;  %v326_v3 = vadd.s32 %v324_v61, %v322_v58  ;;  %v363_v8 = vadd.f32 %v362_v59, %v361_v55  ;;  %v370_v9 = vadd.f32 %v369_v62, %v368_v56 }
  0x38   : > { %v299_v7 = vadd.s32 %v298_v60, %v289_v38  ;;  %v376_v14 = vrot.slane %v375_v63, 4  ;;  %vm388_vm5 = vcmask 1040384  }
  0x39   : > { %v272_v4 = vmul.u32 3, %v271_v57  ;;  %v327_v13 = vadd.s32 %v326_v3, %v316_v47  ;;  %v364_v1 = vrot.slane %v363_v8, 2  ;;  %v371_v19 = vrot.slane %v370_v9, 2 }
  0x3a   : > { %488 = vrot.lane.b32.xlu2 %v1898_v12, %s1622_s23  ;;  %v300_v15 = vshrl.u32 %v299_v7, 1  ;;  %v377_v21 = vadd.f32 %v376_v14, %v375_v63  ;;  %s1634_s23 = smov 42  }
  0x3b   : > { %v328_v16 = vadd.s32 %v327_v13, %v318_v0  ;;  %v273_v17 = vsub.s32 %v1875_v2, %v272_v4  ;;  %v365_v24 = vadd.f32 %v364_v1, %v363_v8  ;;  %v372_v25 = vadd.f32 %v371_v19, %v370_v9 }
  0x3c   : > { %v301_v18 = vmul.u32 3, %v300_v15  ;;  %v378_v2 = vrot.slane %v377_v21, 2 }
  0x3d   : > { %v329_v20 = vshrl.u32 %v328_v16, 1  ;;  %vm334_vm7 = vcmp.ne.s32.totalorder %v273_v17, 0  ;;  %vm337_vm8 = vcmp.lt.s32.totalorder %v273_v17, 0  ;;  %v343_v27 = vadd.s32 3, %v273_v17 }
  0x3e   : > { %v302_v22 = vsub.s32 %v1888_v5, %v301_v18  ;;  %vm340_vm11 = vmand %vm337_vm8, %vm334_vm7  ;;  %v366_v29 = vrot.slane %v365_v24, 1  ;;  %v373_v5 = vrot.slane %v372_v25, 1  ;;  %v379_v30 = vadd.f32 %v378_v2, %v377_v21 }
  0x3f   : > { %v330_v23 = vmul.u32 3, %v329_v20  ;;  %v1925_v32 = vsel %vm340_vm11, %v343_v27, %v273_v17  ;;  %vm860_vm11 = vcmask 23552  }
  0x40   : > { %vm335_vm9 = vcmp.ne.s32.totalorder %v302_v22, 0  ;;  %vm338_vm10 = vcmp.lt.s32.totalorder %v302_v22, 0  ;;  %v344_v28 = vadd.s32 3, %v302_v22  ;;  %v374_v34 = vadd.f32 %v373_v5, %v372_v25 }
  0x41   : > { %v331_v26 = vsub.s32 %v1891_v6, %v330_v23  ;;  %vm341_vm12 = vmand %vm338_vm10, %vm335_vm9  ;;  %v367_v6 = vadd.f32 %v366_v29, %v365_v24  ;;  %v380_v35 = vrot.slane %v379_v30, 1  ;;  %vm382_vm0 = vcmp.eq.s32.totalorder %v1925_v32, 0 }
  0x42   : > { %491 = vrot.lane.b32.xlu2 %v1898_v12, %s1623_s5  ;;  %v1927_v33 = vsel %vm341_vm12, %v344_v28, %v302_v22  ;;  %vm425_vm2 = vcmp.eq.s32.totalorder %v1925_v32, 2  ;;  %vm404_vm8 = vcmp.eq.s32.totalorder %v1925_v32, 1  ;;  %s1635_s5 = smov 81   ;;  %vm862_vm12 = vcmask 48128  }
  0x43   : > { %vm336_vm13 = vcmp.ne.s32.totalorder %v331_v26, 0  ;;  %vm339_vm14 = vcmp.lt.s32.totalorder %v331_v26, 0  ;;  %v345_v31 = vadd.s32 3, %v331_v26  ;;  %vm383_vm1 = vcmp.eq.s32.totalorder %v1927_v33, 0 }
  0x44   : > { %vm342_vm15 = vmand %vm339_vm14, %vm336_vm13  ;;  %vm426_vm4 = vcmp.eq.s32.totalorder %v1927_v33, 2  ;;  %v381_v37 = vadd.f32 %v380_v35, %v379_v30  ;;  %v385_v38 = vsel %vm382_vm0, %v367_v6, 0.0  ;;  %v386_v39 = vsel %vm383_vm1, %v374_v34, 0.0 }
  0x45   : > { %v1932_v36 = vsel %vm342_vm15, %v345_v31, %v331_v26  ;;  %v428_v40 = vsel %vm425_vm2, %v367_v6, 0.0  ;;  %v429_v41 = vsel %vm426_vm4, %v374_v34, 0.0  ;;  %v389_v42 = vsel %vm388_vm5, %v385_v38, 0.0 }
  0x46   : > { %vm384_vm6 = vcmp.eq.s32.totalorder %v1932_v36, 0  ;;  %vm427_vm7 = vcmp.eq.s32.totalorder %v1932_v36, 2  ;;  %v390_v43 = vsel %vm388_vm5, %v386_v39, 0.0  ;;  %v431_v44 = vsel %vm388_vm5, %v428_v40, 0.0 }
  0x47   : > { %v432_v45 = vsel %vm388_vm5, %v429_v41, 0.0  ;;  %v387_v46 = vsel %vm384_vm6, %v381_v37, 0.0  ;;  %v430_v47 = vsel %vm427_vm7, %v381_v37, 0.0  ;;  %vm405_vm9 = vcmp.eq.s32.totalorder %v1927_v33, 1 }
  0x48   : > { %v391_v48 = vadd.f32 %v390_v43, %v389_v42  ;;  %v433_v49 = vadd.f32 %v432_v45, %v431_v44  ;;  %v392_v50 = vsel %vm388_vm5, %v387_v46, 0.0  ;;  %v434_v51 = vsel %vm388_vm5, %v430_v47, 0.0 }
  0x49   : > { %v407_v52 = vsel %vm404_vm8, %v367_v6, 0.0  ;;  %v408_v53 = vsel %vm405_vm9, %v374_v34, 0.0  ;;  %vm406_vm10 = vcmp.eq.s32.totalorder %v1932_v36, 1  ;;  %vm864_vm13 = vcmask 72704  }
  0x4a   : > { %494 = vrot.lane.b32.xlu2 %v1898_v12, %s1624_s9  ;;  %v393_v54 = vadd.f32 %v392_v50, %v391_v48  ;;  %v435_v55 = vadd.f32 %v434_v51, %v433_v49  ;;  %v410_v56 = vsel %vm388_vm5, %v407_v52, 0.0  ;;  %v411_v57 = vsel %vm388_vm5, %v408_v53, 0.0  ;;  %s1636_s9 = smov 48  }
  0x4b   : > { %v409_v58 = vsel %vm406_vm10, %v381_v37, 0.0  ;;  %v412_v59 = vadd.f32 %v411_v57, %v410_v56  ;;  %vm866_vm14 = vcmask 97280   ;;  %vm868_vm15 = vcmask 121856  }
  0x4c   : > { %v413_v60 = vsel %vm388_vm5, %v409_v58, 0.0  ;;  %vm870_vm5 = vcmask 146432  }
  0x4d   : > { %v414_v61 = vadd.f32 %v413_v60, %v412_v59 }
  0x52   : > { %503 = vrot.lane.b32.xlu2 %v1898_v12, %s1625_s27  ;;  %s1637_s27 = smov 51  }
  0x5a   : > { %512 = vrot.lane.b32.xlu2 %v1898_v12, %s1626_s21  ;;  %s1638_s21 = smov 90  }
  0x5c   : > { %394 = vadd.xlane.f32.xlu0 %v393_v54 }
  0x5d   : > { %436 = vadd.xlane.f32.xlu1 %v435_v55 }
  0x62   : > { %521 = vrot.lane.b32.xlu2 %v1898_v12, %s1627_s25  ;;  %s1639_s25 = smov 57  }
  0x64   : > { %415 = vadd.xlane.f32.xlu0 %v414_v61 }
  0x6a   : > { %530 = vrot.lane.b32.xlu2 %v1898_v12, %s1628_s29  ;;  %s1640_s29 = smov 60  }
  0x72   : > { %539 = vrot.lane.b32.xlu2 %v1898_v12, %s1629_s30  ;;  %s1641_s30 = smov 99  }
  0x76   : > { %506 = vrot.lane.b32.xlu1 %v1898_v12, %s1630_s24  ;;  %s1642_s24 = smov 66  }
  0x78   : > { %509 = vrot.lane.b32.xlu0 %v1898_v12, %s1631_s26  ;;  %s1643_s26 = smov 69  }
  0x7a   : > { %548 = vrot.lane.b32.xlu2 %v1898_v12, %s1632_s10  ;;  %s1644_s10 = smov 108  }
  0x7e   : > { %515 = vrot.lane.b32.xlu1 %v1898_v12, %s1633_s11  ;;  %s1645_s11 = smov 75  }
  0x80   : > { %518 = vrot.lane.b32.xlu0 %v1898_v12, %s1634_s23  ;;  %s1646_s23 = smov 78  }
  0x82   : > { %557 = vrot.lane.b32.xlu2 %v1898_v12, %s1635_s5  ;;  %s1647_s5 = smov 117  }
  0x84   : > { %v480_v62 = vpop.permute.xlu2 %479 }
  0x85   : > { %v861_v63 = vsel %vm860_vm11, %v1898_v12, %v480_v62  ;;  %vm872_vm11 = vcmask 171008  }
  0x86   : > { %524 = vrot.lane.b32.xlu1 %v1898_v12, %s1636_s9  ;;  %s1648_s9 = smov 84  }
  0x88   : > { %527 = vrot.lane.b32.xlu0 %v1898_v12, %s1637_s27  ;;  %s1649_s27 = smov 87  }
  0x8a   : > { %566 = vrot.lane.b32.xlu2 %v1898_v12, %s1638_s21  ;;  %s1650_s21 = smov 126  }
  0x8c   : > { %v483_v0 = vpop.permute.xlu2 %482 }
  0x8d   : > { %v863_v3 = vsel %vm862_vm12, %v861_v63, %v483_v0  ;;  %vm874_vm12 = vcmask 195584  }
  0x8e   : > { %533 = vrot.lane.b32.xlu1 %v1898_v12, %s1639_s25  ;;  %s1651_s25 = smov 93  }
  0x90   : > { %536 = vrot.lane.b32.xlu0 %v1898_v12, %s1640_s29  ;;  %s1652_s29 = smov 96  }
  0x92   : > { %575 = vrot.lane.b32.xlu2 %v1898_v12, %s1641_s30  ;;  %s1653_s30 = smov 7  }
  0x94   : > { %v489_v4 = vpop.permute.xlu2 %488 }
  0x96   : > { %542 = vrot.lane.b32.xlu1 %v1898_v12, %s1642_s24  ;;  %s1654_s24 = smov 102  }
  0x98   : > { %545 = vrot.lane.b32.xlu0 %v1898_v12, %s1643_s26  ;;  %s1655_s26 = smov 105  }
  0x9a   : > { %584 = vrot.lane.b32.xlu2 %v1898_v12, %s1644_s10  ;;  %s1656_s10 = smov 16  }
  0x9c   : > { %v492_v7 = vpop.permute.xlu2 %491  ;;  %v486_v8 = vpop.permute.xlu0 %485 }
  0x9d   : > { %v1989_v9 = vpop.permute.xlu1 %468  ;;  %v865_v13 = vsel %vm864_vm13, %v863_v3, %v486_v8  ;;  %vm876_vm13 = vcmask 220160  }
  0x9e   : > { %551 = vrot.lane.b32.xlu1 %v1898_v12, %s1645_s11  ;;  %v867_v14 = vsel %vm866_vm14, %v865_v13, %v489_v4  ;;  %s1657_s11 = smov 111   ;;  %vm878_vm14 = vcmask 244736  }
  0x9f   : > { %v869_v15 = vsel %vm868_vm15, %v867_v14, %v492_v7  ;;  %vm880_vm15 = vcmask 269312  }
  0xa0   : > { %554 = vrot.lane.b32.xlu0 %v1898_v12, %s1646_s23  ;;  %s1658_s23 = smov 114  }
  0xa2   : > { %593 = vrot.lane.b32.xlu2 %v1898_v12, %s1647_s5  ;;  %s1659_s5 = smov 25  }
  0xa4   : > { %v495_v16 = vpop.permute.xlu2 %494  ;;  %v501_v17 = vpop.permute.xlu0 %500 }
  0xa5   : > { %v871_v18 = vsel %vm870_vm5, %v869_v15, %v495_v16  ;;  %v498_v1 = vpop.permute.xlu1 %497  ;;  %vm882_vm5 = vcmask 293888  }
  0xa6   : > { %v873_v19 = vsel %vm872_vm11, %v871_v18, %v498_v1  ;;  %560 = vrot.lane.b32.xlu1 %v1898_v12, %s1648_s9  ;;  %s1660_s9 = smov 120   ;;  %vm884_vm11 = vcmask 318464  }
  0xa7   : > { %v875_v20 = vsel %vm874_vm12, %v873_v19, %v501_v17  ;;  %vm886_vm12 = vcmask 343040  }
  0xa8   : > { %563 = vrot.lane.b32.xlu0 %v1898_v12, %s1649_s27  ;;  %s1661_s27 = smov 123  }
  0xaa   : > { %602 = vrot.lane.b32.xlu2 %v1898_v12, %s1650_s21  ;;  %s1662_s21 = smov 34  }
  0xac   : > { %v504_v21 = vpop.permute.xlu2 %503 }
  0xad   : > { %v1997_v22 = vsel %vm876_vm13, %v875_v20, %v504_v21  ;;  %vm888_vm13 = vcmask 367616  }
  0xae   : > { %569 = vrot.lane.b32.xlu1 %v1898_v12, %s1651_s25  ;;  %s1663_s25 = smov 1  }
  0xb0   : > { %572 = vrot.lane.b32.xlu0 %v1898_v12, %s1652_s29  ;;  %s1664_s29 = smov 4  }
  0xb2   : > { %611 = vrot.lane.b32.xlu2 %v1898_v12, %s1653_s30  ;;  %s1665_s30 = smov 43  }
  0xb4   : > { %v513_v23 = vpop.permute.xlu2 %512 }
  0xb6   : > { %578 = vrot.lane.b32.xlu1 %v1898_v12, %s1654_s24  ;;  %s1666_s24 = smov 10  }
  0xb8   : > { %581 = vrot.lane.b32.xlu0 %v1898_v12, %s1655_s26  ;;  %s1667_s26 = smov 13  }
  0xba   : > { %620 = vrot.lane.b32.xlu2 %v1898_v12, %s1656_s10  ;;  %s1668_s10 = smov 52  }
  0xbc   : > { %v2014_v29 = vpop.permute.xlu2 %521 }
  0xbe   : > { %587 = vrot.lane.b32.xlu1 %v1898_v12, %s1657_s11  ;;  %s1669_s11 = smov 19  }
  0xc0   : > { %590 = vrot.lane.b32.xlu0 %v1898_v12, %s1658_s23  ;;  %s1670_s23 = smov 22  }
  0xc2   : > { %629 = vrot.lane.b32.xlu2 %v1898_v12, %s1659_s5  ;;  %s1671_s5 = smov 61  }
  0xc4   : > { %v531_v40 = vpop.permute.xlu2 %530 }
  0xc6   : > { %596 = vrot.lane.b32.xlu1 %v1898_v12, %s1660_s9  ;;  %s1672_s9 = smov 28  }
  0xc8   : > { %599 = vrot.lane.b32.xlu0 %v1898_v12, %s1661_s27  ;;  %s1673_s27 = smov 31  }
  0xca   : > { %638 = vrot.lane.b32.xlu2 %v1898_v12, %s1662_s21  ;;  %s1674_s21 = smov 70  }
  0xcc   : > { %v540_v47 = vpop.permute.xlu2 %539 }
  0xce   : > { %605 = vrot.lane.b32.xlu1 %v1898_v12, %s1663_s25  ;;  %s1675_s25 = smov 37  }
  0xcf   : > { %v395_v24 = vpop.xlane.xlu0 %394 }
  0xd0   : > { %v437_v25 = vpop.xlane.xlu1 %436  ;;  %v396_v26 = vrot.slane %v395_v24, 4  ;;  %608 = vrot.lane.b32.xlu0 %v1898_v12, %s1664_s29  ;;  %s1676_s29 = smov 40  }
  0xd1   : > { %v438_v2 = vrot.slane %v437_v25, 4 }
  0xd2   : > { %v397_v27 = vadd.f32 %v396_v26, %v395_v24  ;;  %647 = vrot.lane.b32.xlu2 %v1898_v12, %s1665_s30  ;;  %s1677_s30 = smov 79   ;;  %v1690_v24 = vmov 839922192  }
  0xd3   : > { %v439_v28 = vadd.f32 %v438_v2, %v437_v25  ;;  %v471_v25 = vunpack.c.l.s4 %v1690_v24 }
  0xd4   : > { %v398_v5 = vrot.slane %v397_v27, 2  ;;  %v549_v52 = vpop.permute.xlu2 %548 }
  0xd5   : > { %v440_v31 = vrot.slane %v439_v28, 2 }
  0xd6   : > { %614 = vrot.lane.b32.xlu1 %v1898_v12, %s1666_s24  ;;  %v399_v30 = vadd.f32 %v398_v5, %v397_v27  ;;  %s1678_s24 = smov 46  }
  0xd7   : > { %v416_v6 = vpop.xlane.xlu0 %415  ;;  %v441_v39 = vadd.f32 %v440_v31, %v439_v28 }
  0xd8   : > { %v417_v34 = vrot.slane %v416_v6, 4  ;;  %617 = vrot.lane.b32.xlu0 %v1898_v12, %s1667_s26  ;;  %v400_v35 = vrot.slane %v399_v30, 1  ;;  %s1679_s26 = smov 49  }
  0xd9   : > { %v442_v43 = vrot.slane %v441_v39, 1 }
  0xda   : > { %v418_v37 = vadd.f32 %v417_v34, %v416_v6  ;;  %v401_v38 = vadd.f32 %v400_v35, %v399_v30  ;;  %656 = vrot.lane.b32.xlu2 %v1898_v12, %s1668_s10  ;;  %s1680_s10 = smov 88  }
  0xdb   : > { %v443_v46 = vadd.f32 %v442_v43, %v441_v39 }
  0xdc   : > { %v419_v41 = vrot.slane %v418_v37, 2  ;;  %1268 = vpush %v401_v38  ;;  %v2029_v58 = vpop.permute.xlu2 %557 }
  0xde   : > { %623 = vrot.lane.b32.xlu1 %v1898_v12, %s1669_s11  ;;  %v420_v42 = vadd.f32 %v419_v41, %v418_v37  ;;  %s1681_s11 = smov 55  }
  0xe0   : > { %626 = vrot.lane.b32.xlu0 %v1898_v12, %s1670_s23  ;;  %v421_v44 = vrot.slane %v420_v42, 1  ;;  %s1682_s23 = smov 58  }
  0xe2   : > { %v422_v45 = vadd.f32 %v421_v44, %v420_v42  ;;  %665 = vrot.lane.b32.xlu2 %v1898_v12, %s1671_s5  ;;  %s1683_s5 = smov 97  }
  0xe4   : > { %1270 = vpush %v422_v45  ;;  %v2035_v3 = vpop.permute.xlu2 %566 }
  0xe5   : > { %1272 = vpush %v443_v46 }
  0xe6   : > { %632 = vrot.lane.b32.xlu1 %v1898_v12, %s1672_s9  ;;  %s1684_s9 = smov 64  }
  0xe8   : > { %v507_v48 = vpop.permute.xlu1 %506  ;;  %635 = vrot.lane.b32.xlu0 %v1898_v12, %s1673_s27  ;;  %s1685_s27 = smov 67  }
  0xe9   : > { %v879_v49 = vsel %vm878_vm14, %v1997_v22, %v507_v48  ;;  %vm890_vm14 = vcmask 392192  }
  0xea   : > { %v510_v50 = vpop.permute.xlu0 %509  ;;  %674 = vrot.lane.b32.xlu2 %v1898_v12, %s1674_s21  ;;  %s1686_s21 = smov 106  }
  0xeb   : > { %v881_v51 = vsel %vm880_vm15, %v879_v49, %v510_v50  ;;  %vm892_vm15 = vcmask 416768  }
  0xec   : > { %v883_v53 = vsel %vm882_vm5, %v881_v51, %v513_v23  ;;  %vm894_vm5 = vcmask 441344   ;;  %v2040_v15 = vpop.permute.xlu2 %575 }
  0xee   : > { %641 = vrot.lane.b32.xlu1 %v1898_v12, %s1675_s25  ;;  %s1687_s25 = smov 73  }
  0xf0   : > { %v516_v54 = vpop.permute.xlu1 %515  ;;  %644 = vrot.lane.b32.xlu0 %v1898_v12, %s1676_s29 }
  0xf1   : > { %v885_v55 = vsel %vm884_vm11, %v883_v53, %v516_v54  ;;  %vm896_vm11 = vcmask 465920  }
  0xf2   : > { %v519_v56 = vpop.permute.xlu0 %518  ;;  %683 = vrot.lane.b32.xlu2 %v1898_v12, %s1677_s30  ;;  %s1688_s30 = smov 76  }
  0xf3   : > { %v887_v57 = vsel %vm886_vm12, %v885_v55, %v519_v56  ;;  %vm898_vm12 = vcmask 490496  }
  0xf4   : > { %v889_v59 = vsel %vm888_vm13, %v887_v57, %v2014_v29  ;;  %vm900_vm13 = vcmask 515072   ;;  %v2045_v20 = vpop.permute.xlu2 %584  ;;  %v472_v29 = vunpack.c.0.s8 %v471_v25 }
  0xf6   : > { %650 = vrot.lane.b32.xlu1 %v1898_v12, %s1678_s24  ;;  %v2072_v39 = vperm.slane %v1989_v9, %v472_v29 }
  0xf8   : > { %v525_v60 = vpop.permute.xlu1 %524  ;;  %653 = vrot.lane.b32.xlu0 %v1898_v12, %s1679_s26  ;;  %s1689_s26 = smov 115  }
  0xf9   : > { %v891_v61 = vsel %vm890_vm14, %v889_v59, %v525_v60  ;;  %vm902_vm14 = vcmask 539648  }
  0xfa   : > { %v528_v62 = vpop.permute.xlu0 %527  ;;  %692 = vrot.lane.b32.xlu2 %v1898_v12, %s1680_s10 }
  0xfb   : > { %v893_v63 = vsel %vm892_vm15, %v891_v61, %v528_v62  ;;  %vm904_vm15 = vcmask 564224  }
  0xfc   : > { %v895_v0 = vsel %vm894_vm5, %v893_v63, %v531_v40  ;;  %vm906_vm5 = vcmask 588800   ;;  %v2053_v28 = vpop.permute.xlu2 %593 }
  0xfe   : > { %659 = vrot.lane.b32.xlu1 %v1898_v12, %s1681_s11  ;;  %s1691_s11 = smov 82  }
 0x100   : > { %v534_v4 = vpop.permute.xlu1 %533  ;;  %662 = vrot.lane.b32.xlu0 %v1898_v12, %s1682_s23 }
 0x101   : > { %v897_v7 = vsel %vm896_vm11, %v895_v0, %v534_v4  ;;  %vm908_vm11 = vcmask 613376  }
 0x102   : > { %v537_v8 = vpop.permute.xlu0 %536  ;;  %701 = vrot.lane.b32.xlu2 %v1898_v12, %s1683_s5 }
 0x103   : > { %v899_v13 = vsel %vm898_vm12, %v897_v7, %v537_v8  ;;  %vm910_vm12 = vcmask 637952  }
 0x104   : > { %v901_v14 = vsel %vm900_vm13, %v899_v13, %v540_v47  ;;  %vm912_vm13 = vcmask 662528   ;;  %v2076_v43 = vpop.permute.xlu2 %602 }
 0x106   : > { %668 = vrot.lane.b32.xlu1 %v1898_v12, %s1684_s9 }
 0x108   : > { %v543_v16 = vpop.permute.xlu1 %542  ;;  %671 = vrot.lane.b32.xlu0 %v1898_v12, %s1685_s27  ;;  %s1692_s27 = smov 85  }
 0x109   : > { %v903_v17 = vsel %vm902_vm14, %v901_v14, %v543_v16  ;;  %vm914_vm14 = vcmask 687104  }
 0x10a   : > { %v546_v18 = vpop.permute.xlu0 %545  ;;  %710 = vrot.lane.b32.xlu2 %v1898_v12, %s1686_s21  ;;  %s1693_s21 = smov 124  }
 0x10b   : > { %v905_v1 = vsel %vm904_vm15, %v903_v17, %v546_v18  ;;  %vm916_vm15 = vcmask 711680  }
 0x10c   : > { %v907_v19 = vsel %vm906_vm5, %v905_v1, %v549_v52  ;;  %vm918_vm5 = vcmask 736256   ;;  %v612_v47 = vpop.permute.xlu2 %611  ;;  %v2114_v1 = vld [vmem:[%s1882_s20] sm:$0xf]  ;;  %s1715_s20 = smov 26  }
 0x10d   : > { %s1269_s29 = spop %1268 }
 0x10e   : > { %677 = vrot.lane.b32.xlu1 %v1898_v12, %s1687_s25  ;;  %s403_s24 = smul.f32 0.001953125, %s1269_s29  ;;  %s1694_s25 = smov 91  }
 0x10f   : > { %s1695_s29 = smov 94  }
 0x110   : > { %v552_v21 = vpop.permute.xlu1 %551  ;;  %680 = vrot.lane.b32.xlu0 %v1898_v12, %s1688_s30  ;;  %v2051_v27 = vstv %s403_s24  ;;  %s1696_s30 = smov 5   ;;  %s1697_s24 = smov 100  }
 0x111   : > { %v909_v22 = vsel %vm908_vm11, %v907_v19, %v552_v21  ;;  %v449_v5 = vsel %vm384_vm6, %v2051_v27, 0.0  ;;  %vm920_vm6 = vcmask 760832   ;;  %vm926_vm11 = vcmask 834560  }
 0x112   : > { %v555_v23 = vpop.permute.xlu0 %554  ;;  %719 = vrot.lane.b32.xlu2 %v1898_v12, %s1689_s26  ;;  %s1698_s26 = smov 103  }
 0x113   : > { %v911_v26 = vsel %vm910_vm12, %v909_v22, %v555_v23  ;;  %vm928_vm12 = vcmask 859136  }
 0x114   : > { %v913_v2 = vsel %vm912_vm13, %v911_v26, %v2029_v58  ;;  %vm930_vm13 = vcmask 883712   ;;  %v2089_v53 = vpop.permute.xlu2 %620 }
 0x115   : > { %s1271_s10 = spop %1270 }
 0x116   : > { %686 = vrot.lane.b32.xlu1 %v1898_v12, %s1691_s11  ;;  %s424_s23 = smul.f32 0.001953125, %s1271_s10  ;;  %s1273_s5 = spop %1272 }
 0x117   : > { %s445_s9 = smul.f32 0.001953125, %s1273_s5  ;;  %s1699_s10 = smov 14  }
 0x118   : > { %v2059_v30 = vstv %s424_s23  ;;  %v561_v31 = vpop.permute.xlu1 %560  ;;  %689 = vrot.lane.b32.xlu0 %v1898_v12, %s1692_s27  ;;  %s1700_s11 = smov 109   ;;  %s1701_s23 = smov 112  }
 0x119   : > { %v453_v6 = vsel %vm406_vm10, %v2059_v30, %v449_v5  ;;  %v2065_v34 = vstv %s445_s9  ;;  %v915_v37 = vsel %vm914_vm14, %v913_v2, %v561_v31  ;;  %vm924_vm10 = vcmask 809984   ;;  %s1702_s5 = smov 23   ;;  %s1703_s9 = smov 118  }
 0x11a   : > { %v457_v35 = vsel %vm427_vm7, %v2065_v34, %v453_v6  ;;  %v564_v38 = vpop.permute.xlu0 %563  ;;  %728 = vrot.lane.b32.xlu2 %v1898_v12, %s1693_s21  ;;  %vm922_vm7 = vcmask 785408   ;;  %vm932_vm14 = vcmask 908288   ;;  %s1704_s27 = smov 121   ;;  %s1705_s21 = smov 32  }
 0x11b   : > { %v464_v40 = vsub.f32 %v1895_v11, %v457_v35  ;;  %v917_v41 = vsel %vm916_vm15, %v915_v37, %v564_v38  ;;  %vm934_vm15 = vcmask 932864  }
 0x11c   : > { %v919_v42 = vsel %vm918_vm5, %v917_v41, %v2035_v3  ;;  %vm936_vm5 = vcmask 957440   ;;  %v2095_v59 = vpop.permute.xlu2 %629 }
 0x11d   : > { %v2079_v44 = vmul.f32 %v2072_v39, %v464_v40 }
 0x11e   : > { %695 = vrot.lane.b32.xlu1 %v1898_v12, %s1694_s25  ;;  %s1706_s25 = smov 127  }
 0x120   : > { %v570_v36 = vpop.permute.xlu1 %569  ;;  %698 = vrot.lane.b32.xlu0 %v1898_v12, %s1695_s29  ;;  %s1707_s29 = smov 2  }
 0x121   : > { %v921_v9 = vsel %vm920_vm6, %v919_v42, %v570_v36  ;;  %vm938_vm6 = vcmask 982016  }
 0x122   : > { %v573_v11 = vpop.permute.xlu0 %572  ;;  %737 = vrot.lane.b32.xlu2 %v1898_v12, %s1696_s30  ;;  %s1708_s30 = smov 41  }
 0x123   : > { %v923_v45 = vsel %vm922_vm7, %v921_v9, %v573_v11  ;;  %vm940_vm7 = vcmask 1006592  }
 0x124   : > { %v925_v46 = vsel %vm924_vm10, %v923_v45, %v2040_v15  ;;  %vm942_vm10 = vcmask 1031168   ;;  %v2103_v3 = vpop.permute.xlu2 %638 }
 0x126   : > { %704 = vrot.lane.b32.xlu1 %v1898_v12, %s1697_s24  ;;  %s1709_s24 = smov 8  }
 0x128   : > { %v579_v48 = vpop.permute.xlu1 %578  ;;  %707 = vrot.lane.b32.xlu0 %v1898_v12, %s1698_s26  ;;  %s1710_s26 = smov 11  }
 0x129   : > { %v927_v49 = vsel %vm926_vm11, %v925_v46, %v579_v48  ;;  %vm944_vm11 = vcmask 7168  }
 0x12a   : > { %v582_v50 = vpop.permute.xlu0 %581  ;;  %746 = vrot.lane.b32.xlu2 %v1898_v12, %s1699_s10  ;;  %s1711_s10 = smov 50  }
 0x12b   : > { %v929_v51 = vsel %vm928_vm12, %v927_v49, %v582_v50  ;;  %vm946_vm12 = vcmask 31744  }
 0x12c   : > { %v931_v52 = vsel %vm930_vm13, %v929_v51, %v2045_v20  ;;  %vm948_vm13 = vcmask 56320   ;;  %v2109_v15 = vpop.permute.xlu2 %647 }
 0x12e   : > { %713 = vrot.lane.b32.xlu1 %v1898_v12, %s1700_s11  ;;  %s1712_s11 = smov 17  }
 0x130   : > { %v588_v54 = vpop.permute.xlu1 %587  ;;  %716 = vrot.lane.b32.xlu0 %v1898_v12, %s1701_s23  ;;  %s1713_s23 = smov 20  }
 0x131   : > { %v933_v55 = vsel %vm932_vm14, %v931_v52, %v588_v54  ;;  %vm950_vm14 = vcmask 80896  }
 0x132   : > { %v591_v56 = vpop.permute.xlu0 %590  ;;  %755 = vrot.lane.b32.xlu2 %v1898_v12, %s1702_s5  ;;  %s1714_s5 = smov 59  }
 0x133   : > { %v935_v57 = vsel %vm934_vm15, %v933_v55, %v591_v56  ;;  %vm952_vm15 = vcmask 105472  }
 0x134   : > { %v937_v58 = vsel %vm936_vm5, %v935_v57, %v2053_v28  ;;  %v2117_v19 = vpop.permute.xlu2 %656  ;;  %vm954_vm5 = vcmask 130048  }
 0x136   : > { %722 = vrot.lane.b32.xlu1 %v1898_v12, %s1703_s9  ;;  %s1716_s9 = smov 29  }
 0x138   : > { %v597_v60 = vpop.permute.xlu1 %596  ;;  %725 = vrot.lane.b32.xlu0 %v1898_v12, %s1704_s27  ;;  %s1717_s27 = smov 68  }
 0x139   : > { %v939_v61 = vsel %vm938_vm6, %v937_v58, %v597_v60  ;;  %vm956_vm6 = vcmask 154624  }
 0x13a   : > { %v600_v62 = vpop.permute.xlu0 %599  ;;  %764 = vrot.lane.b32.xlu2 %v1898_v12, %s1705_s21  ;;  %s1718_s21 = smov 35  }
 0x13b   : > { %v941_v63 = vsel %vm940_vm7, %v939_v61, %v600_v62  ;;  %vm958_vm7 = vcmask 179200  }
 0x13c   : > { %v2101_v0 = vsel %vm942_vm10, %v941_v63, %v2076_v43  ;;  %vm960_vm10 = vcmask 203776  }
 0x13e   : > { %731 = vrot.lane.b32.xlu1 %v1898_v12, %s1706_s25  ;;  %s1719_s25 = smov 38  }
 0x140   : > { %v606_v4 = vpop.permute.xlu1 %605  ;;  %734 = vrot.lane.b32.xlu0 %v1898_v12, %s1707_s29  ;;  %s1720_s29 = smov 77  }
 0x141   : > { %v945_v7 = vsel %vm944_vm11, %v2076_v43, %v606_v4  ;;  %vm962_vm11 = vcmask 228352  }
 0x142   : > { %v609_v8 = vpop.permute.xlu0 %608  ;;  %773 = vrot.lane.b32.xlu2 %v1898_v12, %s1708_s30  ;;  %s1721_s30 = smov 44  }
 0x143   : > { %v947_v13 = vsel %vm946_vm12, %v945_v7, %v609_v8  ;;  %vm964_vm12 = vcmask 252928  }
 0x144   : > { %v949_v14 = vsel %vm948_vm13, %v947_v13, %v612_v47  ;;  %vm966_vm13 = vcmask 277504  }
 0x146   : > { %740 = vrot.lane.b32.xlu1 %v1898_v12, %s1709_s24  ;;  %s1722_s24 = smov 47  }
 0x148   : > { %v615_v16 = vpop.permute.xlu1 %614  ;;  %743 = vrot.lane.b32.xlu0 %v1898_v12, %s1710_s26  ;;  %v2122_v12 = vpop.permute.xlu2 %665  ;;  %s1723_s26 = smov 86  }
 0x149   : > { %v951_v17 = vsel %vm950_vm14, %v949_v14, %v615_v16  ;;  %vm968_vm14 = vcmask 302080  }
 0x14a   : > { %v618_v18 = vpop.permute.xlu0 %617  ;;  %782 = vrot.lane.b32.xlu2 %v2114_v1, %s1711_s10  ;;  %s1724_s10 = smov 53  }
 0x14b   : > { %v953_v6 = vsel %vm952_vm15, %v951_v17, %v618_v18  ;;  %vm970_vm15 = vcmask 326656  }
 0x14c   : > { %v955_v37 = vsel %vm954_vm5, %v953_v6, %v2089_v53  ;;  %vm972_vm5 = vcmask 351232   ;;  %v447_v6 = vsel %vm382_vm0, %v2051_v27, 0.0  ;;  %vm1026_vm0 = vcmask 1014784  }
 0x14e   : > { %749 = vrot.lane.b32.xlu1 %v2114_v1, %s1712_s11  ;;  %s1725_s11 = smov 56  }
 0x150   : > { %v624_v20 = vpop.permute.xlu1 %623  ;;  %752 = vrot.lane.b32.xlu0 %v2114_v1, %s1713_s23  ;;  %v2127_v24 = vpop.permute.xlu2 %674  ;;  %s1726_s23 = smov 95  }
 0x151   : > { %v957_v38 = vsel %vm956_vm6, %v955_v37, %v624_v20  ;;  %vm974_vm6 = vcmask 375808   ;;  %v451_v37 = vsel %vm404_vm8, %v2059_v30, %v447_v6  ;;  %vm1028_vm8 = vcmask 1039360  }
 0x152   : > { %v627_v21 = vpop.permute.xlu0 %626  ;;  %791 = vrot.lane.b32.xlu2 %v2114_v1, %s1714_s5  ;;  %s1727_s5 = smov 62  }
 0x153   : > { %v959_v41 = vsel %vm958_vm7, %v957_v38, %v627_v21  ;;  %vm976_vm7 = vcmask 400384  }
 0x154   : > { %v961_v43 = vsel %vm960_vm10, %v959_v41, %v2095_v59  ;;  %vm978_vm10 = vcmask 424960  }
 0x156   : > { %758 = vrot.lane.b32.xlu1 %v2114_v1, %s1715_s20  ;;  %s1728_s20 = smov 65  }
 0x158   : > { %v633_v22 = vpop.permute.xlu1 %632  ;;  %761 = vrot.lane.b32.xlu0 %v2114_v1, %s1716_s9  ;;  %v2132_v2 = vpop.permute.xlu2 %683  ;;  %s1729_s9 = smov 104  }
 0x159   : > { %v963_v36 = vsel %vm962_vm11, %v961_v43, %v633_v22  ;;  %vm980_vm11 = vcmask 449536  }
 0x15a   : > { %v636_v23 = vpop.permute.xlu0 %635  ;;  %800 = vrot.lane.b32.xlu2 %v2114_v1, %s1717_s27  ;;  %s1730_s27 = smov 71  }
 0x15b   : > { %v965_v11 = vsel %vm964_vm12, %v963_v36, %v636_v23  ;;  %vm982_vm12 = vcmask 474112   ;;  %v448_v23 = vsel %vm383_vm1, %v2051_v27, 0.0  ;;  %vm1020_vm1 = vcmask 941056  }
 0x15c   : > { %v967_v46 = vsel %vm966_vm13, %v965_v11, %v2103_v3  ;;  %vm984_vm13 = vcmask 498688  }
 0x15e   : > { %767 = vrot.lane.b32.xlu1 %v2114_v1, %s1718_s21  ;;  %s1731_s21 = smov 74  }
 0x160   : > { %v642_v25 = vpop.permute.xlu1 %641  ;;  %770 = vrot.lane.b32.xlu0 %v2114_v1, %s1719_s25  ;;  %v2137_v5 = vpop.permute.xlu2 %692  ;;  %s1732_s25 = smov 113  }
 0x161   : > { %v969_v47 = vsel %vm968_vm14, %v967_v46, %v642_v25  ;;  %vm986_vm14 = vcmask 523264   ;;  %v452_v25 = vsel %vm405_vm9, %v2059_v30, %v448_v23  ;;  %vm1024_vm9 = vcmask 990208  }
 0x162   : > { %v645_v26 = vpop.permute.xlu0 %644  ;;  %809 = vrot.lane.b32.xlu2 %v2114_v1, %s1720_s29  ;;  %s1733_s29 = smov 80  }
 0x163   : > { %v971_v48 = vsel %vm970_vm15, %v969_v47, %v645_v26  ;;  %vm988_vm15 = vcmask 547840  }
 0x164   : > { %v973_v51 = vsel %vm972_vm5, %v971_v48, %v2109_v15  ;;  %vm990_vm5 = vcmask 572416  }
 0x166   : > { %776 = vrot.lane.b32.xlu1 %v2114_v1, %s1721_s30  ;;  %s1734_s30 = smov 83  }
 0x168   : > { %v651_v28 = vpop.permute.xlu1 %650  ;;  %779 = vrot.lane.b32.xlu0 %v2114_v1, %s1722_s24  ;;  %v2143_v40 = vpop.permute.xlu2 %701  ;;  %s1735_s24 = smov 122  }
 0x169   : > { %v975_v52 = vsel %vm974_vm6, %v973_v51, %v651_v28  ;;  %vm992_vm6 = vcmask 596992  }
 0x16a   : > { %v654_v29 = vpop.permute.xlu0 %653  ;;  %818 = vrot.lane.b32.xlu2 %v2114_v1, %s1723_s26  ;;  %s1736_s26 = smov 89  }
 0x16b   : > { %v977_v53 = vsel %vm976_vm7, %v975_v52, %v654_v29  ;;  %vm994_vm7 = vcmask 621568   ;;  %v456_v29 = vsel %vm426_vm4, %v2065_v34, %v452_v25  ;;  %vm1022_vm4 = vcmask 965632  }
 0x16c   : > { %v979_v55 = vsel %vm978_vm10, %v977_v53, %v2117_v19  ;;  %vm996_vm10 = vcmask 646144   ;;  %v460_v38 = vrot.slane %v456_v29, 4 }
 0x16e   : > { %785 = vrot.lane.b32.xlu1 %v2114_v1, %s1724_s10  ;;  %s1737_s10 = smov 92  }
 0x170   : > { %v660_v31 = vpop.permute.xlu1 %659  ;;  %788 = vrot.lane.b32.xlu0 %v2114_v1, %s1725_s11  ;;  %v2149_v45 = vpop.permute.xlu2 %710  ;;  %s1738_s11 = smov 98  }
 0x171   : > { %v981_v57 = vsel %vm980_vm11, %v979_v55, %v660_v31  ;;  %vm998_vm11 = vcmask 670720  }
 0x172   : > { %v663_v35 = vpop.permute.xlu0 %662  ;;  %827 = vrot.lane.b32.xlu2 %v2114_v1, %s1726_s23  ;;  %s1739_s23 = smov 101  }
 0x173   : > { %v983_v58 = vsel %vm982_vm12, %v981_v57, %v663_v35  ;;  %vm1000_vm12 = vcmask 695296  }
 0x174   : > { %v985_v60 = vsel %vm984_vm13, %v983_v58, %v2122_v12  ;;  %vm1002_vm13 = vcmask 719872  }
 0x176   : > { %794 = vrot.lane.b32.xlu1 %v2114_v1, %s1727_s5  ;;  %s1740_s5 = smov 107  }
 0x178   : > { %v669_v42 = vpop.permute.xlu1 %668  ;;  %797 = vrot.lane.b32.xlu0 %v2114_v1, %s1728_s20  ;;  %v2157_v54 = vpop.permute.xlu2 %719  ;;  %s1741_s20 = smov 110  }
 0x179   : > { %v987_v61 = vsel %vm986_vm14, %v985_v60, %v669_v42  ;;  %vm1004_vm14 = vcmask 744448   ;;  %v455_v42 = vsel %vm425_vm2, %v2065_v34, %v451_v37  ;;  %vm1032_vm2 = vcmask 39936  }
 0x17a   : > { %v672_v9 = vpop.permute.xlu0 %671  ;;  %836 = vrot.lane.b32.xlu2 %v2114_v1, %s1729_s9  ;;  %s1742_s9 = smov 116   ;;  %v461_v43 = vsel %vm360_vm3, %v455_v42, %v460_v38 }
 0x17b   : > { %v989_v62 = vsel %vm988_vm15, %v987_v61, %v672_v9  ;;  %vm1006_vm15 = vcmask 769024   ;;  %v463_v9 = vsub.f32 %v1893_v10, %v461_v43 }
 0x17c   : > { %v991_v4 = vsel %vm990_vm5, %v989_v62, %v2127_v24  ;;  %vm1008_vm5 = vcmask 793600  }
 0x17d   : > { %v475_v48 = vmul.f32 %v2072_v39, %v463_v9 }
 0x17e   : > { %803 = vrot.lane.b32.xlu1 %v2114_v1, %s1730_s27  ;;  %s1743_s27 = smov 119  }
 0x180   : > { %v678_v49 = vpop.permute.xlu1 %677  ;;  %806 = vrot.lane.b32.xlu0 %v2114_v1, %s1731_s21  ;;  %v2165_v3 = vpop.permute.xlu2 %728  ;;  %s1744_s21 = smov 125  }
 0x181   : > { %v993_v8 = vsel %vm992_vm6, %v991_v4, %v678_v49  ;;  %vm1010_vm6 = vcmask 818176  }
 0x182   : > { %v681_v50 = vpop.permute.xlu0 %680  ;;  %845 = vrot.lane.b32.xlu2 %v2114_v1, %s1732_s25  ;;  %s2208_s25 = scalar_lea.vmem [#allocation5], %s1267_s8  ;;  %s1274_s8 = smul.u32 3, %s1598_s15 }
 0x183   : > { %v995_v13 = vsel %vm994_vm7, %v993_v8, %v681_v50  ;;  %vm1012_vm7 = vcmask 842752  }
 0x184   : > { %v997_v14 = vsel %vm996_vm10, %v995_v13, %v2132_v2  ;;  %vm1014_vm10 = vcmask 867328  }
 0x186   : > { %812 = vrot.lane.b32.xlu1 %v2114_v1, %s1733_s29  ;;  %s1275_s29 = smul.u32 6, %s1602_s16 }
 0x188   : > { %v687_v56 = vpop.permute.xlu1 %686  ;;  %815 = vrot.lane.b32.xlu0 %v2114_v1, %s1734_s30  ;;  %v738_v19 = vpop.permute.xlu2 %737  ;;  %s1135_s30 = sadd.s32 %s1275_s29, %s1274_s8 }
 0x189   : > { %v999_v15 = vsel %vm998_vm11, %v997_v14, %v687_v56  ;;  %vm1016_vm11 = vcmask 891904  }
 0x18a   : > { %v690_v59 = vpop.permute.xlu0 %689  ;;  %854 = vrot.lane.b32.xlu2 %v2114_v1, %s1735_s24  ;;  %s1261_s24 = sshll.u32 %s1135_s30, 2 }
 0x18b   : > { %v1001_v17 = vsel %vm1000_vm12, %v999_v15, %v690_v59  ;;  %vm1018_vm12 = vcmask 916480  }
 0x18c   : > { %v1003_v20 = vsel %vm1002_vm13, %v1001_v17, %v2137_v5  ;;  %vm1030_vm13 = vcmask 15360  }
 0x18e   : > { %821 = vrot.lane.b32.xlu1 %v2114_v1, %s1736_s26  ;;  %s1137_s26 = scalar_lea.hbm %s2262_s3, %s1261_s24 }
 0x190   : > { %v696_v63 = vpop.permute.xlu1 %695  ;;  %824 = vrot.lane.b32.xlu0 %v2114_v1, %s1737_s10  ;;  %v2184_v5 = vpop.permute.xlu2 %746  ;;  %s1139_s10 = sshll.u32 %s2208_s25, 4  ;;  %s1140_s10 = int_to_ptr.vmem [resolvable:$true] %s1139_s10 }
 0x191   : > { %v1005_v21 = vsel %vm1004_vm14, %v1003_v20, %v696_v63  ;;  %vm1034_vm14 = vcmask 64512  }
 0x192   : > { %v699_v7 = vpop.permute.xlu0 %698 }
 0x193   : > { %v1007_v12 = vsel %vm1006_vm15, %v1005_v21, %v699_v7  ;;  %vm1038_vm15 = vcmask 113664  }
 0x194   : > { %v1009_v24 = vsel %vm1008_vm5, %v1007_v12, %v2143_v40  ;;  %vm1040_vm5 = vcmask 138240  }
 0x196   : > { %830 = vrot.lane.b32.xlu1 %v2114_v1, %s1738_s11  ;;  %s1141_s11 = sshll.u32 %s1137_s26, 4  ;;  %s1142_s11 = int_to_ptr.hbm [resolvable:$true] %s1141_s11 }
 0x198   : > { %v705_v16 = vpop.permute.xlu1 %704  ;;  %833 = vrot.lane.b32.xlu0 %v2114_v1, %s1739_s23  ;;  %v756_v11 = vpop.permute.xlu2 %755  ;;  %s1124_s23 = scalar_lea.sflag [#allocation4], %s1861_s7 }
 0x199   : > { %v1011_v26 = vsel %vm1010_vm6, %v1009_v24, %v705_v16  ;;  %vm1042_vm6 = vcmask 162816  }
 0x19a   : > { %v708_v18 = vpop.permute.xlu0 %707 }
 0x19b   : > { %v1013_v28 = vsel %vm1012_vm7, %v1011_v26, %v708_v18  ;;  %vm1044_vm7 = vcmask 187392  }
 0x19c   : > { %v1015_v31 = vsel %vm1014_vm10, %v1013_v28, %v2149_v45  ;;  %vm1046_vm10 = vcmask 211968  }
 0x19e   : > { %839 = vrot.lane.b32.xlu1 %v2114_v1, %s1740_s5  ;;  %s1530_s5 = sshra.s32 %s1142_s11, 4  ;;  %s1531_s5 = int_to_ptr.hbm [resolvable:$true] %s1530_s5 }
 0x19f   : > { %p1537_p8 = scmp.lt.s32.totalorder %s1531_s5, %s2262_s3 }
 0x1a0   : > { %v714_v22 = vpop.permute.xlu1 %713  ;;  %842 = vrot.lane.b32.xlu0 %v2114_v1, %s1741_s20  ;;  %v765_v53 = vpop.permute.xlu2 %764  ;;  %s1532_s20 = scalar_lea.hbm %s1531_s5, 12 }
 0x1a1   : > { %v1017_v35 = vsel %vm1016_vm11, %v1015_v31, %v714_v22  ;;  %vm1048_vm11 = vcmask 236544   ;;  %p1533_p5 = scmp.ne.s32.totalorder %s1531_s5, %s1532_s20 }
 0x1a2   : > { %v717_v2 = vpop.permute.xlu0 %716 }
 0x1a3   : > { %v1019_v33 = vsel %vm1018_vm12, %v1017_v35, %v717_v2  ;;  %vm1050_vm12 = vcmask 261120   ;;  %p1534_p6 = pnand %p1533_p5, %p1830_p9 }
 0x1a4   : > { %v1021_v27 = vsel %vm1020_vm1, %v1019_v33, %v2157_v54  ;;  %vm1052_vm1 = vcmask 285696  }
 0x1a5   : > { %p1535_p7 = pneg %p1534_p6 }
 0x1a6   : > { %848 = vrot.lane.b32.xlu1 %v2114_v1, %s1742_s9 }
 0x1a8   : > { %v723_v40 = vpop.permute.xlu1 %722  ;;  %851 = vrot.lane.b32.xlu0 %v2114_v1, %s1743_s27  ;;  %v774_v57 = vpop.permute.xlu2 %773 }
 0x1a9   : > { %v1023_v36 = vsel %vm1022_vm4, %v1021_v27, %v723_v40  ;;  %vm1054_vm4 = vcmask 310272  }
 0x1aa   : > { %v726_v41 = vpop.permute.xlu0 %725 }
 0x1ab   : > { %v1025_v30 = vsel %vm1024_vm9, %v1023_v36, %v726_v41  ;;  %vm1056_vm9 = vcmask 334848  }
 0x1ac   : > { %v1027_v45 = vsel %vm1026_vm0, %v1025_v30, %v2165_v3  ;;  %vm1058_vm0 = vcmask 359424  }
 0x1ae   : > { %857 = vrot.lane.b32.xlu1 %v2114_v1, %s1744_s21  ;;  %s1536_s21 = scalar_lea.hbm %s2262_s3, 48 }
 0x1af   : > { %p1538_p10 = scmp.lt.s32.totalorder %s1536_s21, %s1532_s20 }
 0x1b0   : > { %v732_v46 = vpop.permute.xlu1 %731  ;;  %v783_v59 = vpop.permute.xlu2 %782 }
 0x1b1   : > { %v1029_v32 = vsel %vm1028_vm8, %v1027_v45, %v732_v46  ;;  %vm1060_vm8 = vcmask 384000   ;;  %p1539_p11 = por %p1538_p10, %p1537_p8 }
 0x1b2   : > { %v1116_v34 = vrot.slane %v1029_v32, 4  ;;  %v735_v47 = vpop.permute.xlu0 %734 }
 0x1b3   : > { %v1031_v49 = vsel %vm1030_vm13, %v732_v46, %v735_v47  ;;  %vm1062_vm13 = vcmask 408576   ;;  %p1540_p13 = pnand %p1539_p11, %p1535_p7 }
 0x1b4   : > { %v1117_v50 = vsel %vm360_vm3, %v2101_v0, %v1116_v34  ;;  %v1033_v1 = vsel %vm1032_vm2, %v1031_v49, %v738_v19  ;;  %vm1036_vm3 = vcmask 89088   ;;  %vm1064_vm2 = vcmask 433152  }
 0x1b5   : > { %v1119_v51 = vadd.f32 %v1117_v50, %v475_v48 }
 0x1b7   : > { %1121 = vst [vmem:[%s2208_s25] sm:$0xff] %v1119_v51 }
 0x1b8   : > { %v741_v10 = vpop.permute.xlu1 %740  ;;  %v792_v61 = vpop.permute.xlu2 %791 }
 0x1b9   : > { %v1035_v52 = vsel %vm1034_vm14, %v1033_v1, %v741_v10  ;;  %vm1066_vm14 = vcmask 457728  }
 0x1ba   : > { %v744_v54 = vpop.permute.xlu0 %743 }
 0x1bb   : > { %v1037_v4 = vsel %vm1036_vm3, %v1035_v52, %v744_v54  ;;  %vm1068_vm3 = vcmask 482304  }
 0x1bc   : > { %v1039_v13 = vsel %vm1038_vm15, %v1037_v4, %v2184_v5  ;;  %vm1070_vm15 = vcmask 506880  }
 0x1c0   : > { %v750_v55 = vpop.permute.xlu1 %749  ;;  %v801_v7 = vpop.permute.xlu2 %800 }
 0x1c1   : > { %v1041_v14 = vsel %vm1040_vm5, %v1039_v13, %v750_v55  ;;  %vm1072_vm5 = vcmask 531456  }
 0x1c2   : > { %v753_v56 = vpop.permute.xlu0 %752 }
 0x1c3   : > { %v1043_v15 = vsel %vm1042_vm6, %v1041_v14, %v753_v56  ;;  %vm1074_vm6 = vcmask 556032  }
 0x1c4   : > { %v1045_v17 = vsel %vm1044_vm7, %v1043_v15, %v756_v11  ;;  %vm1076_vm7 = vcmask 580608  }
 0x1c8   : > { %v759_v39 = vpop.permute.xlu1 %758  ;;  %v810_v21 = vpop.permute.xlu2 %809 }
 0x1c9   : > { %v1047_v18 = vsel %vm1046_vm10, %v1045_v17, %v759_v39  ;;  %vm1078_vm10 = vcmask 605184  }
 0x1ca   : > { %v762_v58 = vpop.permute.xlu0 %761 }
 0x1cb   : > { %v1049_v20 = vsel %vm1048_vm11, %v1047_v18, %v762_v58  ;;  %vm1080_vm11 = vcmask 629760  }
 0x1cc   : > { %v1051_v12 = vsel %vm1050_vm12, %v1049_v20, %v765_v53  ;;  %vm1082_vm12 = vcmask 654336  }
 0x1d0   : > { %v768_v60 = vpop.permute.xlu1 %767  ;;  %v819_v29 = vpop.permute.xlu2 %818 }
 0x1d1   : > { %v1053_v22 = vsel %vm1052_vm1, %v1051_v12, %v768_v60  ;;  %vm1084_vm1 = vcmask 678912  }
 0x1d2   : > { %v771_v0 = vpop.permute.xlu0 %770 }
 0x1d3   : > { %v1055_v23 = vsel %vm1054_vm4, %v1053_v22, %v771_v0  ;;  %vm1086_vm4 = vcmask 703488  }
 0x1d4   : > { %v1057_v26 = vsel %vm1056_vm9, %v1055_v23, %v774_v57  ;;  %vm1088_vm9 = vcmask 728064  }
 0x1d8   : > { %v777_v62 = vpop.permute.xlu1 %776  ;;  %v828_v41 = vpop.permute.xlu2 %827 }
 0x1d9   : > { %v1059_v2 = vsel %vm1058_vm0, %v1057_v26, %v777_v62  ;;  %vm1090_vm0 = vcmask 752640  }
 0x1da   : > { %v780_v63 = vpop.permute.xlu0 %779 }
 0x1db   : > { %v1061_v28 = vsel %vm1060_vm8, %v1059_v2, %v780_v63  ;;  %vm1092_vm8 = vcmask 777216  }
 0x1dc   : > { %v1063_v5 = vsel %vm1062_vm13, %v1061_v28, %v783_v59  ;;  %vm1094_vm13 = vcmask 801792  }
 0x1e0   : > { %v786_v3 = vpop.permute.xlu1 %785  ;;  %v837_v32 = vpop.permute.xlu2 %836 }
 0x1e1   : > { %v1065_v6 = vsel %vm1064_vm2, %v1063_v5, %v786_v3  ;;  %vm1096_vm2 = vcmask 826368  }
 0x1e2   : > { %v789_v8 = vpop.permute.xlu0 %788 }
 0x1e3   : > { %v1067_v35 = vsel %vm1066_vm14, %v1065_v6, %v789_v8  ;;  %vm1098_vm14 = vcmask 850944  }
 0x1e4   : > { %v1069_v38 = vsel %vm1068_vm3, %v1067_v35, %v792_v61  ;;  %vm1100_vm3 = vcmask 875520  }
 0x1e8   : > { %v795_v16 = vpop.permute.xlu1 %794  ;;  %v846_v53 = vpop.permute.xlu2 %845 }
 0x1e9   : > { %v1071_v33 = vsel %vm1070_vm15, %v1069_v38, %v795_v16  ;;  %vm1102_vm15 = vcmask 900096  }
 0x1ea   : > { %v798_v19 = vpop.permute.xlu0 %797 }
 0x1eb   : > { %v1073_v40 = vsel %vm1072_vm5, %v1071_v33, %v798_v19  ;;  %vm1104_vm5 = vcmask 924672  }
 0x1ec   : > { %v1075_v27 = vsel %vm1074_vm6, %v1073_v40, %v801_v7  ;;  %vm1106_vm6 = vcmask 949248  }
 0x1f0   : > { %v804_v24 = vpop.permute.xlu1 %803  ;;  %v855_v0 = vpop.permute.xlu2 %854 }
 0x1f1   : > { %v1077_v36 = vsel %vm1076_vm7, %v1075_v27, %v804_v24  ;;  %vm1108_vm7 = vcmask 973824  }
 0x1f2   : > { %v807_v25 = vpop.permute.xlu0 %806 }
 0x1f3   : > { %v1079_v30 = vsel %vm1078_vm10, %v1077_v36, %v807_v25  ;;  %vm1110_vm10 = vcmask 998400  }
 0x1f4   : > { %v1081_v9 = vsel %vm1080_vm11, %v1079_v30, %v810_v21  ;;  %vm1112_vm11 = vcmask 1022976  }
 0x1f8   : > { %v813_v31 = vpop.permute.xlu1 %812 }
 0x1f9   : > { %v1083_v11 = vsel %vm1082_vm12, %v1081_v9, %v813_v31 }
 0x1fa   : > { %v816_v37 = vpop.permute.xlu0 %815 }
 0x1fb   : > { %v1085_v46 = vsel %vm1084_vm1, %v1083_v11, %v816_v37 }
 0x1fc   : > { %v1087_v47 = vsel %vm1086_vm4, %v1085_v46, %v819_v29 }
 0x200   : > { %v822_v42 = vpop.permute.xlu1 %821 }
 0x201   : > { %v1089_v48 = vsel %vm1088_vm9, %v1087_v47, %v822_v42 }
 0x202   : > { %v825_v43 = vpop.permute.xlu0 %824 }
 0x203   : > { %v1091_v49 = vsel %vm1090_vm0, %v1089_v48, %v825_v43 }
 0x204   : > { %v1093_v1 = vsel %vm1092_vm8, %v1091_v49, %v828_v41 }
 0x208   : > { %v831_v45 = vpop.permute.xlu1 %830 }
 0x209   : > { %v1095_v51 = vsel %vm1094_vm13, %v1093_v1, %v831_v45 }
 0x20a   : > { %v834_v34 = vpop.permute.xlu0 %833 }
 0x20b   : > { %v1097_v52 = vsel %vm1096_vm2, %v1095_v51, %v834_v34 }
 0x20c   : > { %v1099_v54 = vsel %vm1098_vm14, %v1097_v52, %v837_v32 }
 0x210   : > { %v840_v50 = vpop.permute.xlu1 %839 }
 0x211   : > { %v1101_v55 = vsel %vm1100_vm3, %v1099_v54, %v840_v50 }
 0x212   : > { %v843_v10 = vpop.permute.xlu0 %842 }
 0x213   : > { %v1103_v56 = vsel %vm1102_vm15, %v1101_v55, %v843_v10 }
 0x214   : > { %v1105_v58 = vsel %vm1104_vm5, %v1103_v56, %v846_v53 }
 0x218   : > { %v849_v57 = vpop.permute.xlu1 %848 }
 0x219   : > { %v1107_v59 = vsel %vm1106_vm6, %v1105_v58, %v849_v57 }
 0x21a   : > { %v852_v39 = vpop.permute.xlu0 %851 }
 0x21b   : > { %v1109_v60 = vsel %vm1108_vm7, %v1107_v59, %v852_v39 }
 0x21c   : > { %v1111_v61 = vsel %vm1110_vm10, %v1109_v60, %v855_v0 }
 0x220   : > { %v858_v62 = vpop.permute.xlu1 %857 }
 0x221   : > { %v1113_v63 = vsel %vm1112_vm11, %v1111_v61, %v858_v62 }
 0x222   : > { %v1120_v3 = vadd.f32 %v1113_v63, %v2079_v44 }
 0x224   : > { %1122 = vst [vmem:[%s2208_s25 + $0x8] sm:$0xf] %v1120_v3 }
 0x225   : > { %1543 = shalt.err (!%p1540_p13)
}
 0x226   : > { %1278 = dma.vmem_to_hbm [thread:$0]  (%p1830_p9), %s1140_s10, 192, %s1142_s11, %s1124_s23  }
 0x227 PF: > { %p1289_p0 = scmp.ge.s32.totalorder %s1614_s19, 2  ;;  %s1153_s7 = sand.u32 1, %s1586_s12  }
 0x228   : > { %s1154_s25 = scalar_lea.sflag [#allocation4], %s1153_s7 }
 0x229   : > { %p1285_p1 = pnand %p1289_p0, %p1836_p12 }
 0x22b   : > { %p1286_p2 = pneg %p1285_p1 }
 0x22d   : > { %1581 = dma.done.wait (%p1286_p2), %s1154_s25, 192  }
 0x22e   : > { %1583 = vsyncadd (%p1286_p2), %s1154_s25, 4294967104  ;;  %s19_s19 = sadd.s32 1, %s1614_s19   ;;  %s2270_s28 = sld [smem:[#allocation8_spill]] }
 0x22f   : > { %p16_p4 = scmp.ge.s32.totalorder %s19_s19, 6   ;;  %s2271_s12 = smov %s1590_s13 }
 0x230   : > { %s2272_s13 = smov %s1594_s14  ;;  %s2273_s14 = smov %s1843_s6 }
 0x231   : > { %s2274_s15 = smov %s1606_s17  ;;  %s2275_s16 = smov %s1610_s18 }
 0x232   : > { %s2276_s17 = smov %s2279_s22  ;;  %18 = sbr.rel (!%p16_p4) target bundleno = 7 (0x7), region = 84 }
 0x234   : > { %s2277_s18 = smov %s2270_s28 }
 0x237   :  { %1160 = vsyncpa [#allocation3], 1 }
 0x238   :  { %1162 = vsyncpa [#allocation3 + $0x1], 1 }
 0x239   :  { %1163 = vsyncpa [#allocation4], 1 }
 0x23a   :  { %1165 = vsyncpa [#allocation4 + $0x1], 1 }

</bundles_post_ra>
